<compile_context>
chip_gen: v7x
topology: tpu7x:2x2x1
jax: 0.10.0
libtpu: 0.0.40
codegen_flags: <defaults>
</compile_context>

<pallas_src>
import jax
import jax.numpy as jnp
from jax.experimental import pallas as pl
from jax.experimental.pallas import tpu as pltpu

SCHED_ITER = 32          # input features
HIDDEN = 300             # logical hidden width
OUT = 2                  # logical output width

HIDDEN_PAD = 384         # 3 * 128 lanes -> dense vregs for h1/h2
OUT_PAD = 128            # lane-dense w3 / logits width inside the kernel
OUT_STORE = 8            # narrow HBM output slab; wrapper slices back to OUT

MIN_TB = 256             # minimum batch tile (full-height MXU pass)
MAX_TB = 2048            # cap; per-step VMEM stays well under the 32 MiB scoped limit


def _mlp_kernel(x_ref, w1_ref, b1_ref, w2_ref, b2_ref, w3_ref, b3_ref, o_ref):
    """Whole forward fused in VMEM: 3 bf16 MXU matmuls (f32 acc) + f32 epilogue."""
    x = x_ref[...]                                                       # (tb, 32) bf16

    h1 = jnp.dot(x, w1_ref[...], preferred_element_type=jnp.float32) + b1_ref[...]
    h1 = jnp.maximum(h1, 0.0)                                            # f32 ReLU

    h2 = jnp.dot(h1.astype(jnp.bfloat16), w2_ref[...],
                 preferred_element_type=jnp.float32) + b2_ref[...]
    h2 = jnp.maximum(h2, 0.0)

    logits = jnp.dot(h2.astype(jnp.bfloat16), w3_ref[...],
                     preferred_element_type=jnp.float32) + b3_ref[...]   # (tb, 128) f32

    # sigmoid goes to the EUP (its own VLIW slot); store only the leading OUT_STORE
    # lanes -> 16x less HBM writeback than a 128-wide slab.
    o_ref[...] = jax.nn.sigmoid(logits[:, :OUT_STORE])


def _pad2(a, rows, cols):
    """Zero-pad a 2D array up to (rows, cols)."""
    r, c = a.shape
    return jnp.pad(a, ((0, rows - r), (0, cols - c)))


def prepare_params(params):
    """One-time pad (lane-aligned) + cast of logical params into kernel layout.

    Hoisted out of the per-call path: padded/cast weights are created once and reused.
    Zero padding keeps the math identical (relu(0)=0, padded output cols sliced off).
    """
    return {
        "w1": _pad2(params["w1"], SCHED_ITER, HIDDEN_PAD).astype(jnp.bfloat16),
        "b1": _pad2(params["b1"], 1, HIDDEN_PAD).astype(jnp.float32),
        "w2": _pad2(params["w2"], HIDDEN_PAD, HIDDEN_PAD).astype(jnp.bfloat16),
        "b2": _pad2(params["b2"], 1, HIDDEN_PAD).astype(jnp.float32),
        "w3": _pad2(params["w3"], HIDDEN_PAD, OUT_PAD).astype(jnp.bfloat16),
        "b3": _pad2(params["b3"], 1, OUT_PAD).astype(jnp.float32),
    }


def _pick_tile(batch):
    """Static (trace-time) batch tile: aim for >= 4 grid steps, tb in [256, 2048]."""
    b_est = pl.cdiv(batch, MIN_TB) * MIN_TB
    tb = min(MAX_TB, max(MIN_TB, (b_est // 4 // MIN_TB) * MIN_TB))
    b_pad = pl.cdiv(batch, tb) * tb
    return tb, b_pad


@jax.jit
def mlp_forward(x, prepped):
    """x: (B, SCHED_ITER) float. prepped: output of prepare_params()."""
    B = x.shape[0]
    tb, B_pad = _pick_tile(B)

    # Pad batch to a tile multiple and cast to bf16 (halves the x DMA); padded rows
    # are inert and sliced off below.
    x_p = jnp.pad(x.astype(jnp.bfloat16), ((0, B_pad - B), (0, 0)))

    # Weights/biases: constant block index -> DMA'd once, VMEM-resident across the grid.
    const = lambda shape: pl.BlockSpec(shape, lambda i: (0, 0))

    out_padded = pl.pallas_call(
        _mlp_kernel,
        out_shape=jax.ShapeDtypeStruct((B_pad, OUT_STORE), jnp.float32),
        grid=(B_pad // tb,),
        in_specs=[
            pl.BlockSpec((tb, SCHED_ITER), lambda i: (i, 0)),   # x tile (pipelined)
            const((SCHED_ITER, HIDDEN_PAD)), const((1, HIDDEN_PAD)),
            const((HIDDEN_PAD, HIDDEN_PAD)), const((1, HIDDEN_PAD)),
            const((HIDDEN_PAD, OUT_PAD)),    const((1, OUT_PAD)),
        ],
        out_specs=pl.BlockSpec((tb, OUT_STORE), lambda i: (i, 0)),
        compiler_params=pltpu.CompilerParams(
            dimension_semantics=("parallel",),          # megacore sharding on v7x
            vmem_limit_bytes=32 * 1024 * 1024,
        ),
    )(x_p, prepped["w1"], prepped["b1"], prepped["w2"], prepped["b2"],
      prepped["w3"], prepped["b3"])

    # Slice off batch padding rows and the padded output columns.
    return out_padded[:B, :OUT]


def init_params(key):
    """Deterministic init mimicking nn.Linear default: U(-1/sqrt(fan_in), 1/sqrt(fan_in))."""
    def linear(key, fan_in, fan_out):
        kw, kb = jax.random.split(key)
        bound = 1.0 / jnp.sqrt(jnp.float32(fan_in))
        w = jax.random.uniform(kw, (fan_in, fan_out), jnp.float32, -bound, bound)
        b = jax.random.uniform(kb, (1, fan_out), jnp.float32, -bound, bound)
        return w, b

    k1, k2, k3 = jax.random.split(key, 3)
    w1, b1 = linear(k1, SCHED_ITER, HIDDEN)
    w2, b2 = linear(k2, HIDDEN, HIDDEN)
    w3, b3 = linear(k3, HIDDEN, OUT)
    return {"w1": w1, "b1": b1, "w2": w2, "b2": b2, "w3": w3, "b3": b3}


def reference_forward(x, p):
    h1 = jnp.maximum(x @ p["w1"] + p["b1"], 0.0)
    h2 = jnp.maximum(h1 @ p["w2"] + p["b2"], 0.0)
    return jax.nn.sigmoid(h2 @ p["w3"] + p["b3"])


if __name__ == "__main__":
    key = jax.random.PRNGKey(0)
    k_params, k_x1, k_x2, k_x3 = jax.random.split(key, 4)

    params = init_params(k_params)
    prepped = prepare_params(params)   # one-time pad + bf16 cast (hoisted out of jit path)

    # Small demo batch (single 256-row grid step).
    B = 8
    x = jax.random.normal(k_x1, (B, SCHED_ITER), jnp.float32)
    out = jax.block_until_ready(mlp_forward(x, prepped))
    ref = reference_forward(x, params)
    assert out.shape == (B, OUT)
    assert jnp.allclose(out, ref, atol=2e-2), float(jnp.max(jnp.abs(out - ref)))

    # Non-tile-multiple batch -> tb=256, 4 grid steps (exercises padding + megacore sharding).
    B2 = 777
    x2 = jax.random.normal(k_x2, (B2, SCHED_ITER), jnp.float32)
    out2 = jax.block_until_ready(mlp_forward(x2, prepped))
    ref2 = reference_forward(x2, params)
    assert out2.shape == (B2, OUT)
    assert jnp.allclose(out2, ref2, atol=2e-2), float(jnp.max(jnp.abs(out2 - ref2)))

    # Larger batch -> adaptive tile picks tb=1024, 4 grid steps.
    B3 = 4096
    x3 = jax.random.normal(k_x3, (B3, SCHED_ITER), jnp.float32)
    out3 = jax.block_until_ready(mlp_forward(x3, prepped))
    ref3 = reference_forward(x3, params)
    assert out3.shape == (B3, OUT)
    assert jnp.allclose(out3, ref3, atol=2e-2), float(jnp.max(jnp.abs(out3 - ref3)))

    print("KERNEL_OK")
</pallas_src>

<mosaic_0001>
module attributes {stable_mosaic.version = 11 : i64} {
  func.func @_mlp_kernel(%arg0: i32, %arg1: memref<256x32xbf16, #tpu.memory_space<vmem>>, %arg2: memref<32x384xbf16, #tpu.memory_space<vmem>>, %arg3: memref<1x384xf32, #tpu.memory_space<vmem>>, %arg4: memref<384x384xbf16, #tpu.memory_space<vmem>>, %arg5: memref<1x384xf32, #tpu.memory_space<vmem>>, %arg6: memref<384x128xbf16, #tpu.memory_space<vmem>>, %arg7: memref<1x128xf32, #tpu.memory_space<vmem>>, %arg8: memref<256x8xf32, #tpu.memory_space<vmem>>) attributes {dimension_semantics = [#tpu.dimension_semantics<parallel>], iteration_bounds = array<i64: 1>, scalar_prefetch = 0 : i64, scratch_operands = 0 : i64, tpu.core_type = #tpu.core_type<tc>, window_params = [{transform_indices = @transform_0, window_bounds = array<i64: 256, 32>}, {pipeline_mode = #tpu.pipeline_mode<synchronous>, transform_indices = @transform_1, window_bounds = array<i64: 32, 384>}, {pipeline_mode = #tpu.pipeline_mode<synchronous>, transform_indices = @transform_2, window_bounds = array<i64: 1, 384>}, {pipeline_mode = #tpu.pipeline_mode<synchronous>, transform_indices = @transform_3, window_bounds = array<i64: 384, 384>}, {pipeline_mode = #tpu.pipeline_mode<synchronous>, transform_indices = @transform_4, window_bounds = array<i64: 1, 384>}, {pipeline_mode = #tpu.pipeline_mode<synchronous>, transform_indices = @transform_5, window_bounds = array<i64: 384, 128>}, {pipeline_mode = #tpu.pipeline_mode<synchronous>, transform_indices = @transform_6, window_bounds = array<i64: 1, 128>}, {transform_indices = @transform_7, window_bounds = array<i64: 256, 8>}]} {
    %c0 = arith.constant 0 : index
    %c0_0 = arith.constant 0 : index
    %0 = vector.load %arg1[%c0, %c0_0] : memref<256x32xbf16, #tpu.memory_space<vmem>>, vector<256x32xbf16>
    %c0_1 = arith.constant 0 : index
    %c0_2 = arith.constant 0 : index
    %1 = vector.load %arg2[%c0_1, %c0_2] : memref<32x384xbf16, #tpu.memory_space<vmem>>, vector<32x384xbf16>
    %cst = arith.constant dense<0.000000e+00> : vector<256x384xf32>
    %2 = tpu.matmul %0, %1, %cst {dimension_numbers = #tpu.dot_dimension_numbers<[1], [0], [0], [1], [0, 0, 1, 1], [], []>} : vector<256x32xbf16>, vector<32x384xbf16>, vector<256x384xf32> -> vector<256x384xf32>
    %c0_3 = arith.constant 0 : index
    %c0_4 = arith.constant 0 : index
    %3 = vector.load %arg3[%c0_3, %c0_4] : memref<1x384xf32, #tpu.memory_space<vmem>>, vector<1x384xf32>
    %4 = vector.broadcast %3 : vector<1x384xf32> to vector<256x384xf32>
    %5 = arith.addf %2, %4 : vector<256x384xf32>
    %cst_5 = arith.constant 0.000000e+00 : f32
    %6 = vector.broadcast %cst_5 : f32 to vector<256x384xf32>
    %7 = arith.maximumf %5, %6 : vector<256x384xf32>
    %8 = arith.truncf %7 : vector<256x384xf32> to vector<256x384xbf16>
    %c0_6 = arith.constant 0 : index
    %c0_7 = arith.constant 0 : index
    %9 = vector.load %arg4[%c0_6, %c0_7] : memref<384x384xbf16, #tpu.memory_space<vmem>>, vector<384x384xbf16>
    %cst_8 = arith.constant dense<0.000000e+00> : vector<256x384xf32>
    %10 = tpu.matmul %8, %9, %cst_8 {dimension_numbers = #tpu.dot_dimension_numbers<[1], [0], [0], [1], [0, 0, 1, 1], [], []>} : vector<256x384xbf16>, vector<384x384xbf16>, vector<256x384xf32> -> vector<256x384xf32>
    %c0_9 = arith.constant 0 : index
    %c0_10 = arith.constant 0 : index
    %11 = vector.load %arg5[%c0_9, %c0_10] : memref<1x384xf32, #tpu.memory_space<vmem>>, vector<1x384xf32>
    %12 = vector.broadcast %11 : vector<1x384xf32> to vector<256x384xf32>
    %13 = arith.addf %10, %12 : vector<256x384xf32>
    %cst_11 = arith.constant 0.000000e+00 : f32
    %14 = vector.broadcast %cst_11 : f32 to vector<256x384xf32>
    %15 = arith.maximumf %13, %14 : vector<256x384xf32>
    %16 = arith.truncf %15 : vector<256x384xf32> to vector<256x384xbf16>
    %c0_12 = arith.constant 0 : index
    %c0_13 = arith.constant 0 : index
    %17 = vector.load %arg6[%c0_12, %c0_13] : memref<384x128xbf16, #tpu.memory_space<vmem>>, vector<384x128xbf16>
    %cst_14 = arith.constant dense<0.000000e+00> : vector<256x128xf32>
    %18 = tpu.matmul %16, %17, %cst_14 {dimension_numbers = #tpu.dot_dimension_numbers<[1], [0], [0], [1], [0, 0, 1, 1], [], []>} : vector<256x384xbf16>, vector<384x128xbf16>, vector<256x128xf32> -> vector<256x128xf32>
    %c0_15 = arith.constant 0 : index
    %c0_16 = arith.constant 0 : index
    %19 = vector.load %arg7[%c0_15, %c0_16] : memref<1x128xf32, #tpu.memory_space<vmem>>, vector<1x128xf32>
    %20 = vector.broadcast %19 : vector<1x128xf32> to vector<256x128xf32>
    %21 = arith.addf %18, %20 : vector<256x128xf32>
    %22 = vector.extract_strided_slice %21 {offsets = [0, 0], sizes = [256, 8], strides = [1, 1]} : vector<256x128xf32> to vector<256x8xf32>
    %23 = arith.negf %22 : vector<256x8xf32>
    %24 = math.exp %23 : vector<256x8xf32>
    %cst_17 = arith.constant 1.000000e+00 : f32
    %25 = vector.broadcast %cst_17 : f32 to vector<256x8xf32>
    %26 = arith.addf %25, %24 : vector<256x8xf32>
    %27 = arith.divf %25, %26 : vector<256x8xf32>
    %c0_18 = arith.constant 0 : index
    %c0_19 = arith.constant 0 : index
    %28 = vector.load %arg8[%c0_18, %c0_19] : memref<256x8xf32, #tpu.memory_space<vmem>>, vector<256x8xf32>
    tpu.vector_store %arg8[%c0_18, %c0_19], %27 {strides = array<i32>} : memref<256x8xf32, #tpu.memory_space<vmem>>, vector<256x8xf32>,
    return
  }
  func.func @transform_0(%arg0: i32) -> (i32, i32) {
    %c0_i32 = arith.constant 0 : i32
    %c0_i32_0 = arith.constant 0 : i32
    return %arg0, %c0_i32 : i32, i32
  }
  func.func @transform_1(%arg0: i32) -> (i32, i32) {
    %c0_i32 = arith.constant 0 : i32
    %c0_i32_0 = arith.constant 0 : i32
    %c0_i32_1 = arith.constant 0 : i32
    return %c0_i32, %c0_i32_0 : i32, i32
  }
  func.func @transform_2(%arg0: i32) -> (i32, i32) {
    %c0_i32 = arith.constant 0 : i32
    %c0_i32_0 = arith.constant 0 : i32
    %c0_i32_1 = arith.constant 0 : i32
    return %c0_i32, %c0_i32_0 : i32, i32
  }
  func.func @transform_3(%arg0: i32) -> (i32, i32) {
    %c0_i32 = arith.constant 0 : i32
    %c0_i32_0 = arith.constant 0 : i32
    %c0_i32_1 = arith.constant 0 : i32
    return %c0_i32, %c0_i32_0 : i32, i32
  }
  func.func @transform_4(%arg0: i32) -> (i32, i32) {
    %c0_i32 = arith.constant 0 : i32
    %c0_i32_0 = arith.constant 0 : i32
    %c0_i32_1 = arith.constant 0 : i32
    return %c0_i32, %c0_i32_0 : i32, i32
  }
  func.func @transform_5(%arg0: i32) -> (i32, i32) {
    %c0_i32 = arith.constant 0 : i32
    %c0_i32_0 = arith.constant 0 : i32
    %c0_i32_1 = arith.constant 0 : i32
    return %c0_i32, %c0_i32_0 : i32, i32
  }
  func.func @transform_6(%arg0: i32) -> (i32, i32) {
    %c0_i32 = arith.constant 0 : i32
    %c0_i32_0 = arith.constant 0 : i32
    %c0_i32_1 = arith.constant 0 : i32
    return %c0_i32, %c0_i32_0 : i32, i32
  }
  func.func @transform_7(%arg0: i32) -> (i32, i32) {
    %c0_i32 = arith.constant 0 : i32
    %c0_i32_0 = arith.constant 0 : i32
    return %arg0, %c0_i32 : i32, i32
  }
}

</mosaic_0001>

<bundles_post_ra>
// kernel: mlp_forward.1
= control target key start
LH: loop header
LB: loop body
LE: loop exit
PB: predicated region body
PF: predicated region fallthrough
CT: control target
= control target key end

     0   :  { %12 = vsyncpa [#allocation3], 0  ;;  %s4814_s0 = inlined_call_operand.vmem [shape: bf16[256,32], index: 0, kind: input, shape index: {}]   ;;  %s4815_s1 = inlined_call_operand.vmem [shape: bf16[32,384], index: 1, kind: input, shape index: {}]   ;;  %s4816_s2 = inlined_call_operand.vmem [shape: f32[1,384], index: 2, kind: input, shape index: {}]   ;;  %s4817_s3 = inlined_call_operand.hbm [shape: bf16[384,384], index: 3, kind: input, shape index: {}]   ;;  %s4818_s4 = inlined_call_operand.vmem [shape: f32[1,384], index: 4, kind: input, shape index: {}]   ;;  %s4819_s5 = inlined_call_operand.hbm [shape: bf16[384,128], index: 5, kind: input, shape index: {}]   ;;  %s4820_s6 = inlined_call_operand.vmem [shape: f32[1,128], index: 6, kind: input, shape index: {}]   ;;  %s4821_s7 = inlined_call_operand.vmem [shape: f32[256,8], index: 7, kind: output, shape index: {}]  }
   0x1   :  { %13 = vsyncpa [#allocation5], 0  ;;  %s3936_s24 = smov [#allocation2]   ;;  %s3888_s28 = scalar_lea.hbm %s4817_s3, 9216 }
   0x2   :  { %s25_s25 = sshll.u32 %s3936_s24, 4  ;;  %p3889_p0 = scmp.ne.s32.totalorder %s4817_s3, %s3888_s28  ;;  %s26_s25 = int_to_ptr.vmem [resolvable:$true] %s25_s25 }
   0x3   :  { %p3892_p1 = scmp.lt.u32.totalorder %s3888_s28, %s4817_s3 }
   0x5   :  { %p3894_p2 = pnand %p3892_p1, %p3889_p0 }
   0x7   :  { %3897 = shalt.err (!%p3894_p2)
}
   0x8   :  { %s3898_s10 = scalar_lea.vmem %s26_s25, 9216  ;;  %p3903_p4 = scmp.lt.s32.totalorder %s26_s25, %s26_s25 }
   0x9   :  { %p3899_p3 = scmp.ne.s32.totalorder %s26_s25, %s3898_s10  ;;  %p3904_p5 = scmp.lt.s32.totalorder %s3898_s10, %s3898_s10 }
   0xb   :  { %p3905_p6 = por %p3904_p5, %p3903_p4 }
   0xd   :  { %p3906_p7 = pnand %p3905_p6, %p3899_p3 }
   0xf   :  { %3909 = shalt.err (!%p3906_p7)
}
  0x10   :  { %s3937_s11 = smov 192   ;;  %s3938_s12 = smov 12  }
  0x11   :  { %31 = dma.hbm_to_vmem [thread:$0]  %s4817_s3, 9216, %s26_s25, [#allocation3], %s3937_s11, %s3937_s11, %s3938_s12  }
  0x12   :  { %s3939_s15 = smov [#allocation4]   ;;  %s3910_s19 = scalar_lea.hbm %s4819_s5, 3072 }
  0x13   :  { %s39_s16 = sshll.u32 %s3939_s15, 4  ;;  %p3911_p8 = scmp.ne.s32.totalorder %s4819_s5, %s3910_s19  ;;  %s40_s16 = int_to_ptr.vmem [resolvable:$true] %s39_s16 }
  0x14   :  { %p3914_p9 = scmp.lt.u32.totalorder %s3910_s19, %s4819_s5 }
  0x16   :  { %p3916_p10 = pnand %p3914_p9, %p3911_p8 }
  0x18   :  { %3919 = shalt.err (!%p3916_p10)
}
  0x19   :  { %s3920_s24 = scalar_lea.vmem %s40_s16, 3072  ;;  %p3925_p12 = scmp.lt.s32.totalorder %s40_s16, %s40_s16 }
  0x1a   :  { %p3921_p11 = scmp.ne.s32.totalorder %s40_s16, %s3920_s24  ;;  %p3926_p13 = scmp.lt.s32.totalorder %s3920_s24, %s3920_s24 }
  0x1c   :  { %p3927_p0 = por %p3926_p13, %p3925_p12 }
  0x1e   :  { %p3928_p1 = pnand %p3927_p0, %p3921_p11 }
  0x20   :  { %3931 = shalt.err (!%p3928_p1)
}
  0x21   :  { %s3940_s3 = smov 64   ;;  %s3941_s25 = smov 4  }
  0x22   :  { %45 = dma.hbm_to_vmem [thread:$0]  %s4819_s5, 3072, %s40_s16, [#allocation5], %s3940_s3, %s3940_s3, %s3941_s25  }
  0x23   :  { %3932 = dma.done.wait [#allocation3], 9216  }
  0x24   :  { %3933 = vsyncadd [#allocation3], 4294958080 }
  0x25   :  { %3934 = dma.done.wait [#allocation5], 3072  }
  0x26   :  { %3935 = vsyncadd [#allocation5], 4294964224  ;;  %v3942_v0 = vmov 0   ;;  %v3616_v1 = vld [vmem:[%s4815_s1 + $0x4] ss:$12 sps:$4 sm:$0xff]   ;;  %vm224_vm0 = vcmask 261120  }
  0x27   :  { %305 = vmatprep.mubr.bf16.mxu0 %v3942_v0  ;;  %425 = vmatprep.mubr.bf16.mxu1 %v3942_v0  ;;  %v3618_v2 = vld [vmem:[%s4815_s1] ss:$12 sps:$4 sm:$0xff]   ;;  %v3619_v3 = vld [vmem:[%s4815_s1 + $0x1c] ss:$12 sps:$4 sm:$0xff]   ;;  %v3621_v4 = vld [vmem:[%s4815_s1 + $0x18] ss:$12 sps:$4 sm:$0xff]  }
  0x28   :  { %273 = vmatprep.subr.bf16.mxu0 %v3616_v1  ;;  %3477 = vmatprep.subr.bf16.mxu1 %v3616_v1  ;;  %v3622_v5 = vld [vmem:[%s4814_s0] sm:$0xff]   ;;  %v3623_v6 = vld [vmem:[%s4814_s0 + $0x8] sm:$0xff]   ;;  %v3624_v12 = vld [vmem:[%s4814_s0 + $0x10] sm:$0xff]   ;;  %vm2833_vm1 = vcmask 64512  }
  0x29   :  { %274 = vmatpush1.bf16.msra.mxu0 %v3618_v2  ;;  %3479 = vmatpush1.bf16.msra.mxu1 %v3618_v2  ;;  %v4032_v7 = vld [vmem:[%s4814_s0 + $0x60] sm:$0xff]   ;;  %v3635_v8 = vld [vmem:[%s4815_s1 + $0x8] ss:$12 sps:$4 sm:$0xff]   ;;  %v3625_v14 = vld [vmem:[%s4814_s0 + $0x18] sm:$0xff]  }
  0x2a   :  { %275 = vmatprep.subr.bf16.mxu0 %v3619_v3  ;;  %3478 = vmatprep.subr.bf16.mxu1 %v3619_v3  ;;  %v3638_v9 = vld [vmem:[%s4815_s1 + $0x20] ss:$12 sps:$4 sm:$0xff]   ;;  %v3642_v11 = vld [vmem:[#allocation2 + $0x4] ss:$12 sps:$4 sm:$0xff]   ;;  %v3667_v15 = vld [vmem:[#allocation2 + $0xc8] ss:$12 sps:$4 sm:$0xff]  }
  0x2b   :  { %v4048_v10 = vld [vmem:[%s4814_s0 + $0x68] sm:$0xff]   ;;  %v4061_v13 = vld [vmem:[%s4814_s0 + $0x70] sm:$0xff]   ;;  %v4074_v17 = vld [vmem:[%s4814_s0 + $0x78] sm:$0xff]  }
  0x2c   :  { %v3668_v16 = vld [vmem:[#allocation2 + $0x8] ss:$12 sps:$4 sm:$0xff]   ;;  %v3672_v18 = vld [vmem:[#allocation2 + $0xe0] ss:$12 sps:$4 sm:$0xff]   ;;  %v3677_v21 = vld [vmem:[#allocation2 + $0xf8] ss:$12 sps:$4 sm:$0xff]  }
  0x2d   :  { %276 = vmatpush1.bf16.msra.mxu0 %v3621_v4  ;;  %3480 = vmatpush1.bf16.msra.mxu1 %v3621_v4  ;;  %v3673_v19 = vld [vmem:[#allocation2 + $0x20] ss:$12 sps:$4 sm:$0xff]   ;;  %v3678_v22 = vld [vmem:[#allocation2 + $0x38] ss:$12 sps:$4 sm:$0xff]   ;;  %v3682_v23 = vld [vmem:[#allocation2 + $0x110] ss:$12 sps:$4 sm:$0xff]  }
  0x2e   :  { %3345 = vmatprep.subr.bf16.mxu1 %v3635_v8  ;;  %3073 = vmatprep.subr.bf16.mxu0 %v3667_v15  ;;  %v3626_v20 = vld [vmem:[%s4814_s0 + $0x20] sm:$0xff]   ;;  %v3683_v24 = vld [vmem:[#allocation2 + $0x50] ss:$12 sps:$4 sm:$0xff]   ;;  %v3627_v25 = vld [vmem:[%s4814_s0 + $0x28] sm:$0xff]  }
  0x2f   :  { %v3640_v26 = vld [vmem:[#allocation2] ss:$12 sps:$4 sm:$0xff]   ;;  %v3687_v27 = vld [vmem:[#allocation2 + $0x128] ss:$12 sps:$4 sm:$0xff]   ;;  %v3643_v30 = vld [vmem:[#allocation2 + $0x18] ss:$12 sps:$4 sm:$0xff]  }
  0x30   :  { %2894 = vmatmul.mubr.msk.bf16.vlgmr.msra.gmra.mrb[0].mxu0 %vm224_vm0, %v3622_v5  ;;  %2906 = vmatmul.mubr.msk.bf16.vlgmr.msra.gmra.mrb[0].mxu1 %vm224_vm0, %v4032_v7  ;;  %v3645_v28 = vld [vmem:[#allocation2 + $0x1c] ss:$12 sps:$4 sm:$0xff]   ;;  %v3648_v31 = vld [vmem:[#allocation2 + $0x34] ss:$12 sps:$4 sm:$0xff]   ;;  %v3651_v35 = vld [vmem:[#allocation2 + $0x4c] ss:$12 sps:$4 sm:$0xff]  }
  0x31   :  { %315 = vmatprep.mubr.bf16.mxu0 %v3942_v0  ;;  %3346 = vmatpush3.bf16.msra.mxu1 %v3635_v8  ;;  %v3688_v29 = vld [vmem:[#allocation2 + $0x68] ss:$12 sps:$4 sm:$0xff]   ;;  %v3692_v32 = vld [vmem:[#allocation2 + $0x140] ss:$12 sps:$4 sm:$0xff]   ;;  %v3646_v34 = vld [vmem:[#allocation2 + $0x30] ss:$12 sps:$4 sm:$0xff]  }
  0x32   :  { %435 = vmatprep.mubr.bf16.mxu1 %v3942_v0  ;;  %3347 = vmatprep.subr.bf16.mxu1 %v3638_v9  ;;  %v3628_v33 = vld [vmem:[%s4814_s0 + $0x30] sm:$0xff]   ;;  %v3629_v38 = vld [vmem:[%s4814_s0 + $0x38] sm:$0xff]   ;;  %v3652_v39 = vld [vmem:[#allocation2 + $0x60] ss:$12 sps:$4 sm:$0xff]  }
  0x33   :  { %3074 = vmatpush3.bf16.msra.mxu0 %v3668_v16  ;;  %v3649_v36 = vld [vmem:[#allocation2 + $0x48] ss:$12 sps:$4 sm:$0xff]   ;;  %v3654_v37 = vld [vmem:[#allocation2 + $0x64] ss:$12 sps:$4 sm:$0xff]   ;;  %v3663_v45 = vld [vmem:[#allocation2 + $0xac] ss:$12 sps:$4 sm:$0xff]  }
  0x34   :  { %3075 = vmatprep.subr.bf16.mxu0 %v3672_v18  ;;  %v3657_v40 = vld [vmem:[#allocation2 + $0x7c] ss:$12 sps:$4 sm:$0xff]   ;;  %v3655_v41 = vld [vmem:[#allocation2 + $0x78] ss:$12 sps:$4 sm:$0xff]   ;;  %v3660_v42 = vld [vmem:[#allocation2 + $0x94] ss:$12 sps:$4 sm:$0xff]  }
  0x35   :  { %3348 = vmatpush3.bf16.msra.mxu1 %v3638_v9  ;;  %v3630_v43 = vld [vmem:[%s4814_s0 + $0x40] sm:$0xff]   ;;  %v3658_v44 = vld [vmem:[#allocation2 + $0x90] ss:$12 sps:$4 sm:$0xff]   ;;  %v3661_v46 = vld [vmem:[#allocation2 + $0xa8] ss:$12 sps:$4 sm:$0xff]  }
  0x36   :  { %1268 = vmatprep.subr.bf16.mxu1 %v3642_v11  ;;  %v3666_v47 = vld [vmem:[#allocation2 + $0xc4] ss:$12 sps:$4 sm:$0xff]   ;;  %v3631_v48 = vld [vmem:[%s4814_s0 + $0x48] sm:$0xff]   ;;  %v3676_v53 = vld [vmem:[#allocation2 + $0xf4] ss:$12 sps:$4 sm:$0xff]  }
  0x37   :  { %3076 = vmatpush3.bf16.msra.mxu0 %v3673_v19  ;;  %v3664_v49 = vld [vmem:[#allocation2 + $0xc0] ss:$12 sps:$4 sm:$0xff]   ;;  %v3632_v50 = vld [vmem:[%s4814_s0 + $0x50] sm:$0xff]   ;;  %v3671_v51 = vld [vmem:[#allocation2 + $0xdc] ss:$12 sps:$4 sm:$0xff]  }
  0x38   :  { %2895 = vmatmul.mubr.msk.bf16.gmra.mrb[4].mxu0 %vm224_vm0, %v3623_v6  ;;  %2907 = vmatmul.mubr.msk.bf16.gmra.mrb[4].mxu1 %vm224_vm0, %v4048_v10  ;;  %v3669_v52 = vld [vmem:[#allocation2 + $0xd8] ss:$12 sps:$4 sm:$0xff]   ;;  %v3674_v55 = vld [vmem:[#allocation2 + $0xf0] ss:$12 sps:$4 sm:$0xff]   ;;  %v3679_v57 = vld [vmem:[#allocation2 + $0x108] ss:$12 sps:$4 sm:$0xff]  }
  0x39   :  { %325 = vmatprep.mubr.bf16.mxu0 %v3942_v0  ;;  %445 = vmatprep.mubr.bf16.mxu1 %v3942_v0  ;;  %v3633_v54 = vld [vmem:[%s4814_s0 + $0x58] sm:$0xff]   ;;  %v3693_v58 = vld [vmem:[#allocation2 + $0x80] ss:$12 sps:$4 sm:$0xff]   ;;  %v3686_v59 = vld [vmem:[#allocation2 + $0x124] ss:$12 sps:$4 sm:$0xff]  }
  0x3a   :  { %3077 = vmatprep.subr.bf16.mxu0 %v3677_v21  ;;  %v3681_v56 = vld [vmem:[#allocation2 + $0x10c] ss:$12 sps:$4 sm:$0xff]   ;;  %v3691_v63 = vld [vmem:[#allocation2 + $0x13c] ss:$12 sps:$4 sm:$0xff]   ;;  %v3696_v4 = vld [vmem:[#allocation2 + $0x154] ss:$12 sps:$4 sm:$0xff]  }
  0x3b   :  { %3078 = vmatpush3.bf16.msra.mxu0 %v3678_v22  ;;  %v3697_v60 = vld [vmem:[#allocation2 + $0x158] ss:$12 sps:$4 sm:$0xff]   ;;  %v3684_v61 = vld [vmem:[#allocation2 + $0x120] ss:$12 sps:$4 sm:$0xff]   ;;  %v3702_v1 = vld [vmem:[#allocation2 + $0x170] ss:$12 sps:$4 sm:$0xff]  }
  0x3c   :  { %3079 = vmatprep.subr.bf16.mxu0 %v3682_v23  ;;  %v3698_v62 = vld [vmem:[#allocation2 + $0x98] ss:$12 sps:$4 sm:$0xff]   ;;  %v3703_v3 = vld [vmem:[#allocation2 + $0xb0] ss:$12 sps:$4 sm:$0xff]   ;;  %v3719_v9 = vld [vmem:[#allocation2 + $0x188] ss:$12 sps:$4 sm:$0xff]  }
  0x3d   :  { %v3689_v2 = vld [vmem:[#allocation2 + $0x138] ss:$12 sps:$4 sm:$0xff]  }
  0x3e   :  { %v3706_v8 = vld [vmem:[#allocation2 + $0x184] ss:$12 sps:$4 sm:$0xff]  }
  0x3f   :  { %3080 = vmatpush3.bf16.msra.mxu0 %v3683_v24 }
  0x40   :  { %2896 = vmatmul.mubr.msk.bf16.gmra.mrb[8].mxu0 %vm224_vm0, %v3624_v12  ;;  %2908 = vmatmul.mubr.msk.bf16.gmra.mrb[8].mxu1 %vm224_vm0, %v4061_v13 }
  0x41   :  { %335 = vmatprep.mubr.bf16.mxu0 %v3942_v0  ;;  %455 = vmatprep.mubr.bf16.mxu1 %v3942_v0 }
  0x42   :  { %3081 = vmatprep.subr.bf16.mxu0 %v3687_v27 }
  0x43   :  { %3082 = vmatpush3.bf16.msra.mxu0 %v3688_v29 }
  0x44   :  { %3083 = vmatprep.subr.bf16.mxu0 %v3692_v32 }
  0x47   :  { %3084 = vmatpush3.bf16.msra.mxu0 %v3693_v58  ;;  %v3727_v58 = vld [vmem:[#allocation2 + $0x1b8] ss:$12 sps:$4 sm:$0xff]  }
  0x48   :  { %2897 = vmatmul.mubr.msk.bf16.gmra.mrb[12].mxu0 %vm224_vm0, %v3625_v14  ;;  %2909 = vmatmul.mubr.msk.bf16.gmra.mrb[12].mxu1 %vm224_vm0, %v4074_v17 }
  0x49   :  { %345 = vmatprep.mubr.bf16.mxu0 %v3942_v0  ;;  %3349 = vmatprep.mubr.msk.bf16.mxu1 %vm224_vm0, %v3622_v5  ;;  %v3694_v5 = vld [vmem:[#allocation2 + $0x150] ss:$12 sps:$4 sm:$0xff]  }
  0x4a   :  { %3085 = vmatprep.subr.bf16.mxu0 %v3697_v60 }
  0x4b   :  { %3086 = vmatpush3.bf16.msra.mxu0 %v3698_v62 }
  0x4c   :  { %3087 = vmatprep.subr.bf16.mxu0 %v3702_v1 }
  0x4f   :  { %3088 = vmatpush3.bf16.msra.mxu0 %v3703_v3 }
  0x50   :  { %2898 = vmatmul.mubr.msk.bf16.gmra.mrb[16].mxu0 %vm224_vm0, %v3626_v20  ;;  %3350 = vmatmul.mubr.msk.bf16.vlgmr.msra.gmra.mrb[16].mxu1 %vm224_vm0, %v3623_v6  ;;  %v3701_v6 = vld [vmem:[#allocation2 + $0x16c] ss:$12 sps:$4 sm:$0xff]  }
  0x51   :  { %355 = vmatprep.mubr.bf16.mxu0 %v3942_v0  ;;  %3353 = vmatprep.mubr.msk.bf16.mxu1 %vm224_vm0, %v3624_v12 }
  0x52   :  { %1269 = vmatpush1.bf16.msra.mxu1 %v3640_v26  ;;  %3381 = vmatprep.subr.bf16.mxu0 %v3719_v9 }
  0x53   :  { %1270 = vmatprep.subr.bf16.mxu1 %v3645_v28 }
  0x56   :  { %1271 = vmatpush1.bf16.msra.mxu1 %v3643_v30 }
  0x57   :  { %1272 = vmatprep.subr.bf16.mxu1 %v3648_v31 }
  0x58   :  { %2899 = vmatmul.mubr.msk.bf16.gmra.mrb[20].mxu0 %vm224_vm0, %v3627_v25  ;;  %3354 = vmatmul.mubr.msk.bf16.gmra.mrb[20].mxu1 %vm224_vm0, %v3625_v14 }
  0x59   :  { %365 = vmatprep.mubr.bf16.mxu0 %v3942_v0  ;;  %3357 = vmatprep.mubr.msk.bf16.mxu1 %vm224_vm0, %v3626_v20 }
  0x5a   :  { %1273 = vmatpush1.bf16.msra.mxu1 %v3646_v34 }
  0x5b   :  { %1274 = vmatprep.subr.bf16.mxu1 %v3651_v35 }
  0x5e   :  { %1275 = vmatpush1.bf16.msra.mxu1 %v3649_v36 }
  0x5f   :  { %1276 = vmatprep.subr.bf16.mxu1 %v3654_v37 }
  0x60   :  { %2900 = vmatmul.mubr.msk.bf16.gmra.mrb[24].mxu0 %vm224_vm0, %v3628_v33  ;;  %3358 = vmatmul.mubr.msk.bf16.gmra.mrb[24].mxu1 %vm224_vm0, %v3627_v25 }
  0x61   :  { %375 = vmatprep.mubr.bf16.mxu0 %v3942_v0  ;;  %3361 = vmatprep.mubr.msk.bf16.mxu1 %vm224_vm0, %v3628_v33  ;;  %v3704_v33 = vld [vmem:[#allocation2 + $0x180] ss:$12 sps:$4 sm:$0xff]  }
  0x62   :  { %1277 = vmatpush1.bf16.msra.mxu1 %v3652_v39 }
  0x63   :  { %1278 = vmatprep.subr.bf16.mxu1 %v3657_v40  ;;  %v3723_v40 = vld [vmem:[#allocation2 + $0x1a0] ss:$12 sps:$4 sm:$0xff]  }
  0x66   :  { %1279 = vmatpush1.bf16.msra.mxu1 %v3655_v41 }
  0x67   :  { %1280 = vmatprep.subr.bf16.mxu1 %v3660_v42 }
  0x68   :  { %2901 = vmatmul.mubr.msk.bf16.gmra.mrb[28].mxu0 %vm224_vm0, %v3629_v38  ;;  %3362 = vmatmul.mubr.msk.bf16.gmra.mrb[28].mxu1 %vm224_vm0, %v3629_v38  ;;  %v3709_v38 = vld [vmem:[#allocation2 + $0x19c] ss:$12 sps:$4 sm:$0xff]  }
  0x69   :  { %385 = vmatprep.mubr.bf16.mxu0 %v3942_v0  ;;  %3365 = vmatprep.mubr.msk.bf16.mxu1 %vm224_vm0, %v3630_v43 }
  0x6a   :  { %1281 = vmatpush1.bf16.msra.mxu1 %v3658_v44 }
  0x6b   :  { %1282 = vmatprep.subr.bf16.mxu1 %v3663_v45 }
  0x6e   :  { %1283 = vmatpush1.bf16.msra.mxu1 %v3661_v46 }
  0x6f   :  { %1284 = vmatprep.subr.bf16.mxu1 %v3666_v47 }
  0x70   :  { %2902 = vmatmul.mubr.msk.bf16.gmra.mrb[32].mxu0 %vm224_vm0, %v3630_v43  ;;  %3366 = vmatmul.mubr.msk.bf16.gmra.mrb[32].mxu1 %vm224_vm0, %v3631_v48 }
  0x71   :  { %395 = vmatprep.mubr.bf16.mxu0 %v3942_v0  ;;  %3369 = vmatprep.mubr.msk.bf16.mxu1 %vm224_vm0, %v3632_v50 }
  0x72   :  { %1285 = vmatpush1.bf16.msra.mxu1 %v3664_v49 }
  0x73   :  { %1286 = vmatprep.subr.bf16.mxu1 %v3671_v51 }
  0x76   :  { %1287 = vmatpush1.bf16.msra.mxu1 %v3669_v52  ;;  %v3707_v52 = vld [vmem:[#allocation2 + $0x198] ss:$12 sps:$4 sm:$0xff]  }
  0x77   :  { %1288 = vmatprep.subr.bf16.mxu1 %v3676_v53  ;;  %v3712_v53 = vld [vmem:[#allocation2 + $0x1b4] ss:$12 sps:$4 sm:$0xff]  }
  0x78   :  { %2903 = vmatmul.mubr.msk.bf16.gmra.mrb[36].mxu0 %vm224_vm0, %v3631_v48  ;;  %3370 = vmatmul.mubr.msk.bf16.gmra.mrb[36].mxu1 %vm224_vm0, %v3633_v54 }
  0x79   :  { %405 = vmatprep.mubr.bf16.mxu0 %v3942_v0  ;;  %3373 = vmatprep.mubr.msk.bf16.mxu1 %vm224_vm0, %v4032_v7  ;;  %v3699_v7 = vld [vmem:[#allocation2 + $0x168] ss:$12 sps:$4 sm:$0xff]  }
  0x7a   :  { %1289 = vmatpush1.bf16.msra.mxu1 %v3674_v55 }
  0x7b   :  { %1290 = vmatprep.subr.bf16.mxu1 %v3681_v56 }
  0x7e   :  { %1291 = vmatpush1.bf16.msra.mxu1 %v3679_v57 }
  0x7f   :  { %1292 = vmatprep.subr.bf16.mxu1 %v3686_v59 }
  0x80   :  { %2904 = vmatmul.mubr.msk.bf16.gmra.mrb[40].mxu0 %vm224_vm0, %v3632_v50  ;;  %3374 = vmatmul.mubr.msk.bf16.gmra.mrb[40].mxu1 %vm224_vm0, %v4048_v10  ;;  %v97_v10 = vlaneseq }
  0x81   :  { %415 = vmatprep.mubr.bf16.mxu0 %v3942_v0  ;;  %3377 = vmatprep.mubr.msk.bf16.mxu1 %vm224_vm0, %v4061_v13  ;;  %v4143_v13 = vld [vmem:[%s4816_s2] sm:$0x7] }
  0x82   :  { %1293 = vmatpush1.bf16.msra.mxu1 %v3684_v61  ;;  %v4137_v11 = vshrl.u32 %v97_v10, 7 }
  0x83   :  { %1294 = vmatprep.subr.bf16.mxu1 %v3691_v63 }
  0x84   :  { %v99_v12 = vsub.s32 0, %v4137_v11  ;;  %v103_v14 = vsub.s32 1, %v4137_v11 }
  0x86   :  { %1295 = vmatpush1.bf16.msra.mxu1 %v3689_v2  ;;  %v4149_v15 = vrot.slane %v4143_v13, %v99_v12  ;;  %v4154_v16 = vrot.slane %v4143_v13, %v103_v14 }
  0x87   :  { %1296 = vmatprep.subr.bf16.mxu1 %v3696_v4  ;;  %v3710_v4 = vld [vmem:[#allocation2 + $0x1b0] ss:$12 sps:$4 sm:$0xff]  }
  0x88   :  { %2905 = vmatmul.mubr.msk.bf16.gmra.mrb[44].mxu0 %vm224_vm0, %v3633_v54  ;;  %3378 = vmatmul.mubr.msk.bf16.gmra.mrb[44].mxu1 %vm224_vm0, %v4074_v17 }
  0x8a   :  { %1297 = vmatpush1.bf16.msra.mxu1 %v3694_v5 }
  0x8b   :  { %1298 = vmatprep.subr.bf16.mxu1 %v3701_v6 }
  0x8e   :  { %1299 = vmatpush1.bf16.msra.mxu1 %v3699_v7 }
  0x8f   :  { %1461 = vmatprep.subr.bf16.mxu1 %v3706_v8 }
 0x103   :  { %v307_v17 = vpop.f32.mrb[0].mxu0  ;;  %v427_v30 = vpop.f32.mrb[0].mxu1 }
 0x104   :  { %v308_v18 = vadd.f32 %v307_v17, %v4149_v15  ;;  %v309_v19 = vpop.f32.mrb[1].mxu0  ;;  %v428_v34 = vadd.f32 %v427_v30, %v4149_v15  ;;  %v429_v35 = vpop.f32.mrb[1].mxu1  ;;  %v3718_v30 = vld [vmem:[#allocation2 + $0x1e4] ss:$12 sps:$4 sm:$0xff]  }
 0x105   :  { %v310_v20 = vadd.f32 %v309_v19, %v4154_v16  ;;  %v311_v21 = vpop.f32.mrb[2].mxu0  ;;  %v430_v39 = vadd.f32 %v429_v35, %v4154_v16  ;;  %v431_v41 = vpop.f32.mrb[2].mxu1  ;;  %v3732_v35 = vld [vmem:[#allocation2 + $0x1e8] ss:$12 sps:$4 sm:$0xff]  }
 0x106   :  { %v312_v22 = vadd.f32 %v311_v21, %v4149_v15  ;;  %v313_v23 = vpop.f32.mrb[3].mxu0  ;;  %v627_v25 = vmax.f32 %v308_v18, 0.0  ;;  %v699_v44 = vmax.f32 %v428_v34, 0.0  ;;  %v432_v45 = vadd.f32 %v431_v41, %v4149_v15  ;;  %v433_v46 = vpop.f32.mrb[3].mxu1  ;;  %v3728_v18 = vld [vmem:[#allocation2 + $0x1d0] ss:$12 sps:$4 sm:$0xff]  }
 0x107   :  { %v314_v24 = vadd.f32 %v313_v23, %v4154_v16  ;;  %v628_v27 = vmax.f32 %v310_v20, 0.0  ;;  %v700_v49 = vmax.f32 %v430_v39, 0.0  ;;  %v434_v50 = vadd.f32 %v433_v46, %v4154_v16 }
 0x108   :  { %v630_v26 = vmax.f32 %v312_v22, 0.0  ;;  %v702_v54 = vmax.f32 %v432_v45, 0.0 }
 0x109   :  { %v631_v28 = vmax.f32 %v314_v24, 0.0  ;;  %v703_v57 = vmax.f32 %v434_v50, 0.0 }
 0x10a   :  { %v723_v29 = vpack.c.bf16 %v630_v26, %v627_v25  ;;  %v4168_v61 = vpack.c.bf16 %v702_v54, %v699_v44  ;;  %v3716_v44 = vld [vmem:[#allocation2 + $0x1e0] ss:$12 sps:$4 sm:$0xff]  }
 0x10b   :  { %v724_v31 = vpack.c.bf16 %v631_v28, %v628_v27  ;;  %v317_v32 = vpop.f32.mrb[4].mxu0  ;;  %v4170_v63 = vpack.c.bf16 %v703_v57, %v700_v49  ;;  %v437_v1 = vpop.f32.mrb[4].mxu1  ;;  %v3722_v49 = vld [vmem:[#allocation2 + $0x1fc] ss:$12 sps:$4 sm:$0xff]  }
 0x10c   :  { %v318_v36 = vadd.f32 %v317_v32, %v4149_v15  ;;  %v319_v37 = vpop.f32.mrb[5].mxu0  ;;  %v438_v5 = vadd.f32 %v437_v1, %v4149_v15  ;;  %v439_v6 = vpop.f32.mrb[5].mxu1 }
 0x10d   :  { %v320_v42 = vadd.f32 %v319_v37, %v4154_v16  ;;  %v321_v43 = vpop.f32.mrb[6].mxu0  ;;  %1300 = vmatprep.mubr.bf16.mxu1 %v724_v31  ;;  %1686 = vmatprep.mubr.bf16.mxu0 %v724_v31  ;;  %v440_v10 = vadd.f32 %v439_v6, %v4154_v16  ;;  %v441_v17 = vpop.f32.mrb[6].mxu1 }
 0x10e   :  { %v322_v47 = vadd.f32 %v321_v43, %v4149_v15  ;;  %v323_v48 = vpop.f32.mrb[7].mxu0  ;;  %1301 = vmatmul.mubr.bf16.vlgmr.msra.gmra.mrb[48].mxu1 %v723_v29  ;;  %1687 = vmatmul.mubr.bf16.vlgmr.msra.gmra.mrb[48].mxu0 %v723_v29  ;;  %v633_v55 = vmax.f32 %v318_v36, 0.0  ;;  %v705_v21 = vmax.f32 %v438_v5, 0.0  ;;  %v442_v22 = vadd.f32 %v441_v17, %v4149_v15  ;;  %v443_v23 = vpop.f32.mrb[7].mxu1  ;;  %v3713_v29 = vld [vmem:[#allocation2 + $0x1c8] ss:$12 sps:$4 sm:$0xff]  }
 0x10f   :  { %v324_v51 = vadd.f32 %v323_v48, %v4154_v16  ;;  %1462 = vmatpush1.bf16.msra.mxu1 %v3704_v33  ;;  %3382 = vmatpush3.bf16.msra.mxu0 %v3719_v9  ;;  %v634_v59 = vmax.f32 %v320_v42, 0.0  ;;  %v3715_v9 = vld [vmem:[#allocation2 + $0x1cc] ss:$12 sps:$4 sm:$0xff]   ;;  %v706_v26 = vmax.f32 %v440_v10, 0.0  ;;  %v444_v27 = vadd.f32 %v443_v23, %v4154_v16  ;;  %v3724_v23 = vld [vmem:[#allocation2 + $0x210] ss:$12 sps:$4 sm:$0xff]  }
 0x110   :  { %v636_v56 = vmax.f32 %v322_v47, 0.0  ;;  %1463 = vmatprep.subr.bf16.mxu1 %v3709_v38  ;;  %3383 = vmatprep.subr.bf16.mxu0 %v3723_v40  ;;  %v708_v31 = vmax.f32 %v442_v22, 0.0 }
 0x111   :  { %v637_v60 = vmax.f32 %v324_v51, 0.0  ;;  %v709_v34 = vmax.f32 %v444_v27, 0.0 }
 0x112   :  { %v726_v62 = vpack.c.bf16 %v636_v56, %v633_v55  ;;  %v4180_v38 = vpack.c.bf16 %v708_v31, %v705_v21  ;;  %v3731_v31 = vld [vmem:[#allocation2 + $0x22c] ss:$12 sps:$4 sm:$0xff]  }
 0x113   :  { %v727_v2 = vpack.c.bf16 %v637_v60, %v634_v59  ;;  %v327_v3 = vpop.f32.mrb[8].mxu0  ;;  %1464 = vmatpush1.bf16.msra.mxu1 %v3707_v52  ;;  %3384 = vmatpush3.bf16.msra.mxu0 %v3723_v40  ;;  %v4182_v40 = vpack.c.bf16 %v709_v34, %v706_v26  ;;  %v447_v41 = vpop.f32.mrb[8].mxu1  ;;  %v3733_v52 = vld [vmem:[#allocation2 + $0x200] ss:$12 sps:$4 sm:$0xff]   ;;  %v107_v26 = vsub.s32 2, %v4137_v11 }
 0x114   :  { %v328_v7 = vadd.f32 %v327_v3, %v4149_v15  ;;  %v329_v8 = vpop.f32.mrb[9].mxu0  ;;  %1465 = vmatprep.subr.bf16.mxu1 %v3712_v53  ;;  %3385 = vmatprep.subr.bf16.mxu0 %v3727_v58  ;;  %v448_v45 = vadd.f32 %v447_v41, %v4149_v15  ;;  %v449_v46 = vpop.f32.mrb[9].mxu1  ;;  %v3726_v3 = vld [vmem:[#allocation2 + $0x214] ss:$12 sps:$4 sm:$0xff]  }
 0x115   :  { %v330_v19 = vadd.f32 %v329_v8, %v4154_v16  ;;  %v331_v20 = vpop.f32.mrb[10].mxu0  ;;  %1310 = vmatprep.mubr.bf16.mxu1 %v727_v2  ;;  %1694 = vmatprep.mubr.bf16.mxu0 %v727_v2  ;;  %v450_v50 = vadd.f32 %v449_v46, %v4154_v16  ;;  %v451_v51 = vpop.f32.mrb[10].mxu1  ;;  %v3720_v2 = vld [vmem:[#allocation2 + $0x1f8] ss:$12 sps:$4 sm:$0xff]   ;;  %v3729_v46 = vld [vmem:[#allocation2 + $0x228] ss:$12 sps:$4 sm:$0xff]  }
 0x116   :  { %v332_v24 = vadd.f32 %v331_v20, %v4149_v15  ;;  %v333_v25 = vpop.f32.mrb[11].mxu0  ;;  %1311 = vmatmul.mubr.bf16.gmra.mrb[52].mxu1 %v726_v62  ;;  %1695 = vmatmul.mubr.bf16.gmra.mrb[52].mxu0 %v726_v62  ;;  %v639_v32 = vmax.f32 %v328_v7, 0.0  ;;  %v711_v55 = vmax.f32 %v448_v45, 0.0  ;;  %v452_v56 = vadd.f32 %v451_v51, %v4149_v15  ;;  %v453_v57 = vpop.f32.mrb[11].mxu1  ;;  %v3734_v8 = vld [vmem:[#allocation2 + $0x218] ss:$12 sps:$4 sm:$0xff]  }
 0x117   :  { %v334_v28 = vadd.f32 %v333_v25, %v4154_v16  ;;  %1466 = vmatpush1.bf16.msra.mxu1 %v3710_v4  ;;  %3386 = vmatpush3.bf16.msra.mxu0 %v3727_v58  ;;  %v640_v36 = vmax.f32 %v330_v19, 0.0  ;;  %v712_v60 = vmax.f32 %v450_v50, 0.0  ;;  %v454_v62 = vadd.f32 %v453_v57, %v4154_v16 }
 0x118   :  { %v642_v33 = vmax.f32 %v332_v24, 0.0  ;;  %1467 = vmatprep.subr.bf16.mxu1 %v3715_v9  ;;  %3387 = vmatprep.subr.bf16.mxu0 %v3728_v18  ;;  %v714_v4 = vmax.f32 %v452_v56, 0.0 }
 0x119   :  { %v643_v37 = vmax.f32 %v334_v28, 0.0  ;;  %v715_v7 = vmax.f32 %v454_v62, 0.0 }
 0x11a   :  { %v729_v39 = vpack.c.bf16 %v642_v33, %v639_v32  ;;  %v4192_v17 = vpack.c.bf16 %v714_v4, %v711_v55  ;;  %v3735_v32 = vld [vmem:[#allocation2 + $0x230] ss:$12 sps:$4 sm:$0xff]  }
 0x11b   :  { %v730_v42 = vpack.c.bf16 %v643_v37, %v640_v36  ;;  %v337_v43 = vpop.f32.mrb[12].mxu0  ;;  %1468 = vmatpush1.bf16.msra.mxu1 %v3713_v29  ;;  %3388 = vmatpush3.bf16.msra.mxu0 %v3728_v18  ;;  %v4194_v19 = vpack.c.bf16 %v715_v7, %v712_v60  ;;  %v457_v20 = vpop.f32.mrb[12].mxu1 }
 0x11c   :  { %v338_v47 = vadd.f32 %v337_v43, %v4149_v15  ;;  %v339_v48 = vpop.f32.mrb[13].mxu0  ;;  %1469 = vmatprep.subr.bf16.mxu1 %v3718_v30  ;;  %3389 = vmatprep.subr.bf16.mxu0 %v3732_v35  ;;  %v458_v24 = vadd.f32 %v457_v20, %v4149_v15  ;;  %v459_v25 = vpop.f32.mrb[13].mxu1 }
 0x11d   :  { %v340_v53 = vadd.f32 %v339_v48, %v4154_v16  ;;  %v341_v54 = vpop.f32.mrb[14].mxu0  ;;  %1320 = vmatprep.mubr.bf16.mxu1 %v730_v42  ;;  %1702 = vmatprep.mubr.bf16.mxu0 %v730_v42  ;;  %v460_v29 = vadd.f32 %v459_v25, %v4154_v16  ;;  %v461_v30 = vpop.f32.mrb[14].mxu1 }
 0x11e   :  { %v342_v58 = vadd.f32 %v341_v54, %v4149_v15  ;;  %v343_v59 = vpop.f32.mrb[15].mxu0  ;;  %1321 = vmatmul.mubr.bf16.gmra.mrb[56].mxu1 %v729_v39  ;;  %1703 = vmatmul.mubr.bf16.gmra.mrb[56].mxu0 %v729_v39  ;;  %v645_v5 = vmax.f32 %v338_v47, 0.0  ;;  %v462_v36 = vadd.f32 %v461_v30, %v4149_v15  ;;  %v463_v37 = vpop.f32.mrb[15].mxu1  ;;  %v4208_v47 = vrot.slane %v4143_v13, %v107_v26 }
 0x11f   :  { %v344_v1 = vadd.f32 %v343_v59, %v4154_v16  ;;  %1470 = vmatpush1.bf16.msra.mxu1 %v3716_v44  ;;  %3390 = vmatpush3.bf16.msra.mxu0 %v3732_v35  ;;  %v646_v9 = vmax.f32 %v340_v53, 0.0  ;;  %v717_v35 = vmax.f32 %v458_v24, 0.0  ;;  %v718_v42 = vmax.f32 %v460_v29, 0.0 }
 0x120   :  { %v648_v6 = vmax.f32 %v342_v58, 0.0  ;;  %1471 = vmatprep.subr.bf16.mxu1 %v3722_v49  ;;  %3391 = vmatprep.subr.bf16.mxu0 %v3733_v52  ;;  %v464_v43 = vadd.f32 %v463_v37, %v4154_v16  ;;  %v720_v45 = vmax.f32 %v462_v36, 0.0 }
 0x121   :  { %v649_v10 = vmax.f32 %v344_v1, 0.0 }
 0x122   :  { %v732_v18 = vpack.c.bf16 %v648_v6, %v645_v5  ;;  %v721_v50 = vmax.f32 %v464_v43, 0.0  ;;  %v4210_v53 = vpack.c.bf16 %v720_v45, %v717_v35 }
 0x123   :  { %v733_v21 = vpack.c.bf16 %v649_v10, %v646_v9  ;;  %v347_v22 = vpop.f32.mrb[16].mxu0  ;;  %1472 = vmatpush1.bf16.msra.mxu1 %v3720_v2  ;;  %3392 = vmatpush3.bf16.msra.mxu0 %v3733_v52  ;;  %v3351_v56 = vpop.f32.mrb[16].mxu1 }
 0x124   :  { %v348_v27 = vadd.f32 %v347_v22, %v4149_v15  ;;  %v349_v28 = vpop.f32.mrb[17].mxu0  ;;  %1473 = vmatprep.subr.bf16.mxu1 %v3726_v3  ;;  %3393 = vmatprep.subr.bf16.mxu0 %v3734_v8  ;;  %v4212_v55 = vpack.c.bf16 %v721_v50, %v718_v42  ;;  %v509_v13 = vadd.f32 %v3351_v56, %v4208_v47  ;;  %v500_v59 = vpop.f32.mrb[17].mxu1 }
 0x125   :  { %v350_v33 = vadd.f32 %v349_v28, %v4154_v16  ;;  %v351_v34 = vpop.f32.mrb[18].mxu0  ;;  %1330 = vmatprep.mubr.bf16.mxu1 %v733_v21  ;;  %1710 = vmatprep.mubr.bf16.mxu0 %v733_v21  ;;  %v501_v1 = vadd.f32 %v500_v59, %v4208_v47  ;;  %v3352_v2 = vpop.f32.mrb[18].mxu1 }
 0x126   :  { %v352_v39 = vadd.f32 %v351_v34, %v4149_v15  ;;  %v353_v41 = vpop.f32.mrb[19].mxu0  ;;  %1331 = vmatmul.mubr.bf16.gmra.mrb[60].mxu1 %v732_v18  ;;  %1711 = vmatmul.mubr.bf16.gmra.mrb[60].mxu0 %v732_v18  ;;  %v651_v48 = vmax.f32 %v348_v27, 0.0  ;;  %v635_v5 = vmax.f32 %v509_v13, 0.0  ;;  %v512_v6 = vadd.f32 %v3352_v2, %v4208_v47  ;;  %v503_v7 = vpop.f32.mrb[19].mxu1 }
 0x127   :  { %v354_v44 = vadd.f32 %v353_v41, %v4154_v16  ;;  %1474 = vmatpush1.bf16.msra.mxu1 %v3724_v23  ;;  %3394 = vmatpush3.bf16.msra.mxu0 %v3734_v8  ;;  %v652_v51 = vmax.f32 %v350_v33, 0.0  ;;  %v629_v10 = vmax.f32 %v501_v1, 0.0  ;;  %v504_v18 = vadd.f32 %v503_v7, %v4208_v47 }
 0x128   :  { %v654_v49 = vmax.f32 %v352_v39, 0.0  ;;  %1475 = vmatprep.subr.bf16.mxu1 %v3731_v31  ;;  %3395 = vmatprep.subr.bf16.mxu0 %v3735_v32  ;;  %v638_v21 = vmax.f32 %v512_v6, 0.0 }
 0x129   :  { %v655_v52 = vmax.f32 %v354_v44, 0.0  ;;  %v632_v24 = vmax.f32 %v504_v18, 0.0 }
 0x12a   :  { %v735_v54 = vpack.c.bf16 %v654_v49, %v651_v48  ;;  %v4222_v28 = vpack.c.bf16 %v638_v21, %v635_v5 }
 0x12b   :  { %v736_v57 = vpack.c.bf16 %v655_v52, %v652_v51  ;;  %v357_v58 = vpop.f32.mrb[20].mxu0  ;;  %1476 = vmatpush1.bf16.msra.mxu1 %v3729_v46  ;;  %3396 = vmatpush3.bf16.msra.mxu0 %v3735_v32  ;;  %v4224_v30 = vpack.c.bf16 %v632_v24, %v629_v10  ;;  %v3355_v31 = vpop.f32.mrb[20].mxu1 }
 0x12c   :  { %v358_v60 = vadd.f32 %v357_v58, %v4149_v15  ;;  %v359_v62 = vpop.f32.mrb[21].mxu0  ;;  %v525_v34 = vadd.f32 %v3355_v31, %v4208_v47  ;;  %v516_v35 = vpop.f32.mrb[21].mxu1 }
 0x12d   :  { %v360_v3 = vadd.f32 %v359_v62, %v4154_v16  ;;  %v361_v4 = vpop.f32.mrb[22].mxu0  ;;  %1340 = vmatprep.mubr.bf16.mxu1 %v736_v57  ;;  %1718 = vmatprep.mubr.bf16.mxu0 %v736_v57  ;;  %v517_v39 = vadd.f32 %v516_v35, %v4208_v47  ;;  %v3356_v41 = vpop.f32.mrb[22].mxu1 }
 0x12e   :  { %v362_v8 = vadd.f32 %v361_v4, %v4149_v15  ;;  %v363_v9 = vpop.f32.mrb[23].mxu0  ;;  %1341 = vmatmul.mubr.bf16.gmra.mrb[64].mxu1 %v735_v54  ;;  %1719 = vmatmul.mubr.bf16.gmra.mrb[64].mxu0 %v735_v54  ;;  %v657_v22 = vmax.f32 %v358_v60, 0.0  ;;  %v647_v44 = vmax.f32 %v525_v34, 0.0  ;;  %v528_v45 = vadd.f32 %v3356_v41, %v4208_v47  ;;  %v519_v46 = vpop.f32.mrb[23].mxu1 }
 0x12f   :  { %v364_v20 = vadd.f32 %v363_v9, %v4154_v16  ;;  %v658_v25 = vmax.f32 %v360_v3, 0.0  ;;  %v641_v50 = vmax.f32 %v517_v39, 0.0  ;;  %v520_v51 = vadd.f32 %v519_v46, %v4208_v47 }
 0x130   :  { %v660_v23 = vmax.f32 %v362_v8, 0.0  ;;  %v650_v54 = vmax.f32 %v528_v45, 0.0 }
 0x131   :  { %v661_v27 = vmax.f32 %v364_v20, 0.0  ;;  %v644_v58 = vmax.f32 %v520_v51, 0.0 }
 0x132   :  { %v738_v29 = vpack.c.bf16 %v660_v23, %v657_v22  ;;  %v4234_v60 = vpack.c.bf16 %v650_v54, %v647_v44 }
 0x133   :  { %v739_v32 = vpack.c.bf16 %v661_v27, %v658_v25  ;;  %v367_v33 = vpop.f32.mrb[24].mxu0  ;;  %v4236_v1 = vpack.c.bf16 %v644_v58, %v641_v50  ;;  %v3359_v2 = vpop.f32.mrb[24].mxu1 }
 0x134   :  { %v368_v36 = vadd.f32 %v367_v33, %v4149_v15  ;;  %v369_v37 = vpop.f32.mrb[25].mxu0  ;;  %v541_v5 = vadd.f32 %v3359_v2, %v4208_v47  ;;  %v532_v6 = vpop.f32.mrb[25].mxu1 }
 0x135   :  { %v370_v42 = vadd.f32 %v369_v37, %v4154_v16  ;;  %v371_v43 = vpop.f32.mrb[26].mxu0  ;;  %1350 = vmatprep.mubr.bf16.mxu1 %v739_v32  ;;  %1726 = vmatprep.mubr.bf16.mxu0 %v739_v32  ;;  %v533_v9 = vadd.f32 %v532_v6, %v4208_v47  ;;  %v3360_v10 = vpop.f32.mrb[26].mxu1 }
 0x136   :  { %v372_v48 = vadd.f32 %v371_v43, %v4149_v15  ;;  %v373_v49 = vpop.f32.mrb[27].mxu0  ;;  %1351 = vmatmul.mubr.bf16.gmra.mrb[68].mxu1 %v738_v29  ;;  %1727 = vmatmul.mubr.bf16.gmra.mrb[68].mxu0 %v738_v29  ;;  %v663_v56 = vmax.f32 %v368_v36, 0.0  ;;  %v659_v21 = vmax.f32 %v541_v5, 0.0  ;;  %v544_v22 = vadd.f32 %v3360_v10, %v4208_v47  ;;  %v535_v23 = vpop.f32.mrb[27].mxu1 }
 0x137   :  { %v374_v52 = vadd.f32 %v373_v49, %v4154_v16  ;;  %v664_v13 = vmax.f32 %v370_v42, 0.0  ;;  %v653_v27 = vmax.f32 %v533_v9, 0.0  ;;  %v536_v29 = vadd.f32 %v535_v23, %v4208_v47 }
 0x138   :  { %v666_v57 = vmax.f32 %v372_v48, 0.0  ;;  %v662_v32 = vmax.f32 %v544_v22, 0.0 }
 0x139   :  { %v667_v59 = vmax.f32 %v374_v52, 0.0  ;;  %v656_v35 = vmax.f32 %v536_v29, 0.0 }
 0x13a   :  { %v741_v62 = vpack.c.bf16 %v666_v57, %v663_v56  ;;  %v4246_v39 = vpack.c.bf16 %v662_v32, %v659_v21 }
 0x13b   :  { %v742_v3 = vpack.c.bf16 %v667_v59, %v664_v13  ;;  %v377_v4 = vpop.f32.mrb[28].mxu0  ;;  %v4248_v42 = vpack.c.bf16 %v656_v35, %v653_v27  ;;  %v3363_v43 = vpop.f32.mrb[28].mxu1 }
 0x13c   :  { %v378_v7 = vadd.f32 %v377_v4, %v4149_v15  ;;  %v379_v8 = vpop.f32.mrb[29].mxu0  ;;  %v557_v46 = vadd.f32 %v3363_v43, %v4208_v47  ;;  %v548_v48 = vpop.f32.mrb[29].mxu1 }
 0x13d   :  { %v380_v18 = vadd.f32 %v379_v8, %v4154_v16  ;;  %v381_v20 = vpop.f32.mrb[30].mxu0  ;;  %1360 = vmatprep.mubr.bf16.mxu1 %v742_v3  ;;  %1734 = vmatprep.mubr.bf16.mxu0 %v742_v3  ;;  %v549_v51 = vadd.f32 %v548_v48, %v4208_v47  ;;  %v3364_v52 = vpop.f32.mrb[30].mxu1 }
 0x13e   :  { %v382_v24 = vadd.f32 %v381_v20, %v4149_v15  ;;  %v383_v25 = vpop.f32.mrb[31].mxu0  ;;  %1361 = vmatmul.mubr.bf16.gmra.mrb[72].mxu1 %v741_v62  ;;  %1735 = vmatmul.mubr.bf16.gmra.mrb[72].mxu0 %v741_v62  ;;  %v669_v33 = vmax.f32 %v378_v7, 0.0  ;;  %v671_v57 = vmax.f32 %v557_v46, 0.0  ;;  %v560_v58 = vadd.f32 %v3364_v52, %v4208_v47  ;;  %v551_v13 = vpop.f32.mrb[31].mxu1 }
 0x13f   :  { %v384_v31 = vadd.f32 %v383_v25, %v4154_v16  ;;  %v670_v36 = vmax.f32 %v380_v18, 0.0  ;;  %v665_v2 = vmax.f32 %v549_v51, 0.0  ;;  %v552_v3 = vadd.f32 %v551_v13, %v4208_v47 }
 0x140   :  { %v672_v34 = vmax.f32 %v382_v24, 0.0  ;;  %v674_v5 = vmax.f32 %v560_v58, 0.0 }
 0x141   :  { %v673_v37 = vmax.f32 %v384_v31, 0.0  ;;  %v668_v8 = vmax.f32 %v552_v3, 0.0 }
 0x142   :  { %v744_v41 = vpack.c.bf16 %v672_v34, %v669_v33  ;;  %v4258_v18 = vpack.c.bf16 %v674_v5, %v671_v57 }
 0x143   :  { %v745_v44 = vpack.c.bf16 %v673_v37, %v670_v36  ;;  %v387_v45 = vpop.f32.mrb[32].mxu0  ;;  %v4260_v21 = vpack.c.bf16 %v668_v8, %v665_v2  ;;  %v3367_v22 = vpop.f32.mrb[32].mxu1 }
 0x144   :  { %v388_v49 = vadd.f32 %v387_v45, %v4149_v15  ;;  %v389_v50 = vpop.f32.mrb[33].mxu0  ;;  %v573_v25 = vadd.f32 %v3367_v22, %v4208_v47  ;;  %v564_v27 = vpop.f32.mrb[33].mxu1 }
 0x145   :  { %v390_v54 = vadd.f32 %v389_v50, %v4154_v16  ;;  %v391_v56 = vpop.f32.mrb[34].mxu0  ;;  %1370 = vmatprep.mubr.bf16.mxu1 %v745_v44  ;;  %1742 = vmatprep.mubr.bf16.mxu0 %v745_v44  ;;  %v565_v32 = vadd.f32 %v564_v27, %v4208_v47  ;;  %v3368_v33 = vpop.f32.mrb[34].mxu1 }
 0x146   :  { %v392_v59 = vadd.f32 %v391_v56, %v4149_v15  ;;  %v393_v62 = vpop.f32.mrb[35].mxu0  ;;  %1371 = vmatmul.mubr.bf16.gmra.mrb[76].mxu1 %v744_v41  ;;  %1743 = vmatmul.mubr.bf16.gmra.mrb[76].mxu0 %v744_v41  ;;  %v675_v6 = vmax.f32 %v388_v49, 0.0  ;;  %v683_v36 = vmax.f32 %v573_v25, 0.0  ;;  %v576_v37 = vadd.f32 %v3368_v33, %v4208_v47  ;;  %v567_v41 = vpop.f32.mrb[35].mxu1 }
 0x147   :  { %v394_v4 = vadd.f32 %v393_v62, %v4154_v16  ;;  %v676_v9 = vmax.f32 %v390_v54, 0.0  ;;  %v677_v45 = vmax.f32 %v565_v32, 0.0  ;;  %v568_v46 = vadd.f32 %v567_v41, %v4208_v47 }
 0x148   :  { %v678_v7 = vmax.f32 %v392_v59, 0.0  ;;  %v686_v49 = vmax.f32 %v576_v37, 0.0 }
 0x149   :  { %v679_v10 = vmax.f32 %v394_v4, 0.0  ;;  %v680_v52 = vmax.f32 %v568_v46, 0.0 }
 0x14a   :  { %v747_v20 = vpack.c.bf16 %v678_v7, %v675_v6  ;;  %v4270_v57 = vpack.c.bf16 %v686_v49, %v683_v36 }
 0x14b   :  { %v748_v23 = vpack.c.bf16 %v679_v10, %v676_v9  ;;  %v397_v24 = vpop.f32.mrb[36].mxu0  ;;  %v4272_v13 = vpack.c.bf16 %v680_v52, %v677_v45  ;;  %v3371_v59 = vpop.f32.mrb[36].mxu1 }
 0x14c   :  { %v398_v29 = vadd.f32 %v397_v24, %v4149_v15  ;;  %v399_v31 = vpop.f32.mrb[37].mxu0  ;;  %v589_v3 = vadd.f32 %v3371_v59, %v4208_v47  ;;  %v580_v4 = vpop.f32.mrb[37].mxu1 }
 0x14d   :  { %v400_v34 = vadd.f32 %v399_v31, %v4154_v16  ;;  %v401_v35 = vpop.f32.mrb[38].mxu0  ;;  %1380 = vmatprep.mubr.bf16.mxu1 %v748_v23  ;;  %1750 = vmatprep.mubr.bf16.mxu0 %v748_v23  ;;  %v581_v7 = vadd.f32 %v580_v4, %v4208_v47  ;;  %v3372_v8 = vpop.f32.mrb[38].mxu1 }
 0x14e   :  { %v402_v43 = vadd.f32 %v401_v35, %v4149_v15  ;;  %v403_v44 = vpop.f32.mrb[39].mxu0  ;;  %1381 = vmatmul.mubr.bf16.gmra.mrb[80].mxu1 %v747_v20  ;;  %1751 = vmatmul.mubr.bf16.gmra.mrb[80].mxu0 %v747_v20  ;;  %v681_v50 = vmax.f32 %v398_v29, 0.0  ;;  %v695_v20 = vmax.f32 %v589_v3, 0.0  ;;  %v592_v22 = vadd.f32 %v3372_v8, %v4208_v47  ;;  %v583_v23 = vpop.f32.mrb[39].mxu1 }
 0x14f   :  { %v404_v48 = vadd.f32 %v403_v44, %v4154_v16  ;;  %v682_v54 = vmax.f32 %v400_v34, 0.0  ;;  %v689_v27 = vmax.f32 %v581_v7, 0.0  ;;  %v584_v29 = vadd.f32 %v583_v23, %v4208_v47 }
 0x150   :  { %v684_v51 = vmax.f32 %v402_v43, 0.0  ;;  %v698_v32 = vmax.f32 %v592_v22, 0.0 }
 0x151   :  { %v685_v56 = vmax.f32 %v404_v48, 0.0  ;;  %v692_v35 = vmax.f32 %v584_v29, 0.0 }
 0x152   :  { %v750_v58 = vpack.c.bf16 %v684_v51, %v681_v50  ;;  %v4282_v41 = vpack.c.bf16 %v698_v32, %v695_v20 }
 0x153   :  { %v751_v62 = vpack.c.bf16 %v685_v56, %v682_v54  ;;  %v407_v2 = vpop.f32.mrb[40].mxu0  ;;  %v4284_v44 = vpack.c.bf16 %v692_v35, %v689_v27  ;;  %v3375_v45 = vpop.f32.mrb[40].mxu1 }
 0x154   :  { %v408_v5 = vadd.f32 %v407_v2, %v4149_v15  ;;  %v409_v6 = vpop.f32.mrb[41].mxu0  ;;  %v605_v49 = vadd.f32 %v3375_v45, %v4208_v47  ;;  %v596_v50 = vpop.f32.mrb[41].mxu1 }
 0x155   :  { %v410_v9 = vadd.f32 %v409_v6, %v4154_v16  ;;  %v411_v10 = vpop.f32.mrb[42].mxu0  ;;  %1390 = vmatprep.mubr.bf16.mxu1 %v751_v62  ;;  %1758 = vmatprep.mubr.bf16.mxu0 %v751_v62  ;;  %v597_v54 = vadd.f32 %v596_v50, %v4208_v47  ;;  %v3376_v56 = vpop.f32.mrb[42].mxu1 }
 0x156   :  { %v412_v24 = vadd.f32 %v411_v10, %v4149_v15  ;;  %v413_v25 = vpop.f32.mrb[43].mxu0  ;;  %1391 = vmatmul.mubr.bf16.gmra.mrb[84].mxu1 %v750_v58  ;;  %1759 = vmatmul.mubr.bf16.gmra.mrb[84].mxu0 %v750_v58  ;;  %v687_v33 = vmax.f32 %v408_v5, 0.0  ;;  %v707_v62 = vmax.f32 %v605_v49, 0.0  ;;  %v608_v2 = vadd.f32 %v3376_v56, %v4208_v47  ;;  %v599_v3 = vpop.f32.mrb[43].mxu1  ;;  %v3758_v56 = vld [vmem:[#allocation4 + $0xb0] sm:$0xff]  }
 0x157   :  { %v414_v31 = vadd.f32 %v413_v25, %v4154_v16  ;;  %v688_v36 = vmax.f32 %v410_v9, 0.0  ;;  %v701_v6 = vmax.f32 %v597_v54, 0.0  ;;  %v600_v7 = vadd.f32 %v599_v3, %v4208_v47  ;;  %v3756_v3 = vld [vmem:[#allocation4 + $0x78] sm:$0xff]  }
 0x158   :  { %v690_v34 = vmax.f32 %v412_v24, 0.0  ;;  %v710_v9 = vmax.f32 %v608_v2, 0.0 }
 0x159   :  { %v691_v37 = vmax.f32 %v414_v31, 0.0  ;;  %v704_v22 = vmax.f32 %v600_v7, 0.0 }
 0x15a   :  { %v753_v43 = vpack.c.bf16 %v690_v34, %v687_v33  ;;  %v4294_v25 = vpack.c.bf16 %v710_v9, %v707_v62 }
 0x15b   :  { %v754_v46 = vpack.c.bf16 %v691_v37, %v688_v36  ;;  %v417_v48 = vpop.f32.mrb[44].mxu0  ;;  %v4296_v29 = vpack.c.bf16 %v704_v22, %v701_v6 }
 0x15c   :  { %v418_v51 = vadd.f32 %v417_v48, %v4149_v15  ;;  %v419_v52 = vpop.f32.mrb[45].mxu0 }
 0x15d   :  { %v420_v58 = vadd.f32 %v419_v52, %v4154_v16  ;;  %v421_v59 = vpop.f32.mrb[46].mxu0  ;;  %1400 = vmatprep.mubr.bf16.mxu1 %v754_v46  ;;  %1766 = vmatprep.mubr.bf16.mxu0 %v754_v46  ;;  %v3755_v52 = vld [vmem:[#allocation4 + $0xa8] sm:$0xff]  }
 0x15e   :  { %v422_v4 = vadd.f32 %v421_v59, %v4149_v15  ;;  %v423_v5 = vpop.f32.mrb[47].mxu0  ;;  %1401 = vmatmul.mubr.bf16.gmra.mrb[88].mxu1 %v753_v43  ;;  %1767 = vmatmul.mubr.bf16.gmra.mrb[88].mxu0 %v753_v43  ;;  %v693_v10 = vmax.f32 %v418_v51, 0.0  ;;  %v3379_v15 = vpop.f32.mrb[44].mxu1  ;;  %v3752_v51 = vld [vmem:[#allocation4 + $0x70] sm:$0xff]  }
 0x15f   :  { %v424_v8 = vadd.f32 %v423_v5, %v4154_v16  ;;  %v694_v23 = vmax.f32 %v420_v58, 0.0  ;;  %v621_v32 = vadd.f32 %v3379_v15, %v4208_v47  ;;  %v612_v33 = vpop.f32.mrb[45].mxu1 }
 0x160   :  { %v696_v20 = vmax.f32 %v422_v4, 0.0  ;;  %v613_v34 = vadd.f32 %v612_v33, %v4208_v47  ;;  %v3380_v35 = vpop.f32.mrb[46].mxu1  ;;  %v3757_v4 = vld [vmem:[#allocation4 + $0x38] sm:$0xff]  }
 0x161   :  { %v697_v24 = vmax.f32 %v424_v8, 0.0  ;;  %v719_v16 = vmax.f32 %v621_v32, 0.0  ;;  %v624_v36 = vadd.f32 %v3380_v35, %v4208_v47  ;;  %v615_v37 = vpop.f32.mrb[47].mxu1 }
 0x162   :  { %v756_v27 = vpack.c.bf16 %v696_v20, %v693_v10  ;;  %v713_v43 = vmax.f32 %v613_v34, 0.0  ;;  %v616_v45 = vadd.f32 %v615_v37, %v4208_v47  ;;  %v3742_v47 = vld [vmem:[#allocation4 + $0x10] sm:$0xff]  }
 0x163   :  { %v757_v31 = vpack.c.bf16 %v697_v24, %v694_v23  ;;  %v722_v46 = vmax.f32 %v624_v36, 0.0 }
 0x164   :  { %v716_v48 = vmax.f32 %v616_v45, 0.0 }
 0x165   :  { %1410 = vmatprep.mubr.bf16.mxu1 %v757_v31  ;;  %1774 = vmatprep.mubr.bf16.mxu0 %v757_v31  ;;  %v4304_v49 = vpack.c.bf16 %v722_v46, %v719_v16 }
 0x166   :  { %1411 = vmatmul.mubr.bf16.gmra.mrb[92].mxu1 %v756_v27  ;;  %1775 = vmatmul.mubr.bf16.gmra.mrb[92].mxu0 %v756_v27  ;;  %v4306_v50 = vpack.c.bf16 %v716_v48, %v713_v43 }
 0x167   :  { %1420 = vmatprep.mubr.bf16.mxu1 %v4170_v63  ;;  %1782 = vmatprep.mubr.bf16.mxu0 %v4170_v63  ;;  %v3737_v63 = vld [vmem:[#allocation4] sm:$0xff]  }
 0x16e   :  { %1421 = vmatmul.mubr.bf16.gmra.mrb[96].mxu1 %v4168_v61  ;;  %1783 = vmatmul.mubr.bf16.gmra.mrb[96].mxu0 %v4168_v61  ;;  %v3736_v61 = vld [vmem:[#allocation4 + $0x40] sm:$0xff]  }
 0x16f   :  { %1430 = vmatprep.mubr.bf16.mxu1 %v4182_v40  ;;  %1790 = vmatprep.mubr.bf16.mxu0 %v4182_v40  ;;  %v3739_v40 = vld [vmem:[#allocation4 + $0x48] sm:$0xff]  }
 0x170   :  { %3209 = vmatprep.subr.bf16.mxu0 %v3736_v61 }
 0x176   :  { %1431 = vmatmul.mubr.bf16.gmra.mrb[100].mxu1 %v4180_v38  ;;  %1791 = vmatmul.mubr.bf16.gmra.mrb[100].mxu0 %v4180_v38  ;;  %v3738_v38 = vld [vmem:[#allocation4 + $0x80] sm:$0xff]  }
 0x177   :  { %1440 = vmatprep.mubr.bf16.mxu1 %v4194_v19  ;;  %1798 = vmatprep.mubr.bf16.mxu0 %v4194_v19  ;;  %v3741_v19 = vld [vmem:[#allocation4 + $0x50] sm:$0xff]  }
 0x178   :  { %3429 = vmatprep.subr.bf16.mxu1 %v3738_v38 }
 0x17e   :  { %1441 = vmatmul.mubr.bf16.gmra.mrb[104].mxu1 %v4192_v17  ;;  %1799 = vmatmul.mubr.bf16.gmra.mrb[104].mxu0 %v4192_v17  ;;  %v3740_v17 = vld [vmem:[#allocation4 + $0x8] sm:$0xff]  }
 0x17f   :  { %1450 = vmatprep.mubr.bf16.mxu1 %v4212_v55  ;;  %1806 = vmatprep.mubr.bf16.mxu0 %v4212_v55  ;;  %v3744_v55 = vld [vmem:[#allocation4 + $0x58] sm:$0xff]  }
 0x186   :  { %1451 = vmatmul.mubr.bf16.gmra.mrb[108].mxu1 %v4210_v53  ;;  %1807 = vmatmul.mubr.bf16.gmra.mrb[108].mxu0 %v4210_v53  ;;  %v3743_v53 = vld [vmem:[#allocation4 + $0x88] sm:$0xff]  }
 0x187   :  { %3397 = vmatprep.mubr.bf16.mxu0 %v4224_v30  ;;  %1493 = vmatprep.mubr.bf16.mxu1 %v3942_v0 }
 0x18e   :  { %1494 = vmatmul.mubr.bf16.vlgmr.msra.gmra.mrb[48].mxu1 %v4224_v30  ;;  %3398 = vmatmul.mubr.bf16.vlgmr.msra.gmra.mrb[112].mxu0 %v4222_v28  ;;  %v3746_v30 = vld [vmem:[#allocation4 + $0x60] sm:$0xff]  }
 0x18f   :  { %1503 = vmatprep.mubr.bf16.mxu1 %v3942_v0  ;;  %3401 = vmatprep.mubr.bf16.mxu0 %v4236_v1 }
 0x190   :  { %3210 = vmatpush3.bf16.msra.mxu0 %v3737_v63  ;;  %3430 = vmatpush3.bf16.msra.mxu1 %v3738_v38 }
 0x191   :  { %3211 = vmatprep.subr.bf16.mxu0 %v3739_v40  ;;  %3431 = vmatprep.subr.bf16.mxu1 %v3743_v53 }
 0x194   :  { %3212 = vmatpush3.bf16.msra.mxu0 %v3740_v17  ;;  %3432 = vmatpush3.bf16.msra.mxu1 %v3743_v53 }
 0x195   :  { %3213 = vmatprep.subr.bf16.mxu0 %v3741_v19 }
 0x196   :  { %1504 = vmatmul.mubr.bf16.gmra.mrb[52].mxu1 %v4222_v28  ;;  %3402 = vmatmul.mubr.bf16.gmra.mrb[116].mxu0 %v4234_v60  ;;  %v3745_v28 = vld [vmem:[#allocation4 + $0x18] sm:$0xff]  }
 0x197   :  { %1513 = vmatprep.mubr.bf16.mxu1 %v3942_v0  ;;  %3405 = vmatprep.mubr.bf16.mxu0 %v4248_v42 }
 0x198   :  { %3214 = vmatpush3.bf16.msra.mxu0 %v3742_v47 }
 0x199   :  { %3215 = vmatprep.subr.bf16.mxu0 %v3744_v55 }
 0x19c   :  { %3216 = vmatpush3.bf16.msra.mxu0 %v3745_v28 }
 0x19d   :  { %3217 = vmatprep.subr.bf16.mxu0 %v3746_v30 }
 0x19e   :  { %1514 = vmatmul.mubr.bf16.gmra.mrb[56].mxu1 %v4236_v1  ;;  %3406 = vmatmul.mubr.bf16.gmra.mrb[120].mxu0 %v4246_v39  ;;  %v3748_v1 = vld [vmem:[#allocation4 + $0x90] sm:$0xff]  }
 0x19f   :  { %1523 = vmatprep.mubr.bf16.mxu1 %v3942_v0  ;;  %3409 = vmatprep.mubr.bf16.mxu0 %v4260_v21 }
 0x1a0   :  { %3433 = vmatprep.subr.bf16.mxu1 %v3748_v1 }
 0x1a1   :  { %3434 = vmatpush3.bf16.msra.mxu1 %v3748_v1 }
 0x1a6   :  { %1524 = vmatmul.mubr.bf16.gmra.mrb[60].mxu1 %v4234_v60  ;;  %3410 = vmatmul.mubr.bf16.gmra.mrb[124].mxu0 %v4258_v18  ;;  %v3747_v60 = vld [vmem:[#allocation4 + $0x20] sm:$0xff]  }
 0x1a7   :  { %1533 = vmatprep.mubr.bf16.mxu1 %v3942_v0  ;;  %3413 = vmatprep.mubr.bf16.mxu0 %v4272_v13 }
 0x1a8   :  { %3218 = vmatpush3.bf16.msra.mxu0 %v3747_v60 }
 0x1ae   :  { %1534 = vmatmul.mubr.bf16.gmra.mrb[64].mxu1 %v4248_v42  ;;  %3414 = vmatmul.mubr.bf16.gmra.mrb[128].mxu0 %v4270_v57  ;;  %v3750_v42 = vld [vmem:[#allocation4 + $0x28] sm:$0xff]  }
 0x1af   :  { %1543 = vmatprep.mubr.bf16.mxu1 %v3942_v0  ;;  %3417 = vmatprep.mubr.bf16.mxu0 %v4284_v44 }
 0x1b6   :  { %1544 = vmatmul.mubr.bf16.gmra.mrb[68].mxu1 %v4246_v39  ;;  %3418 = vmatmul.mubr.bf16.gmra.mrb[132].mxu0 %v4282_v41  ;;  %v3749_v39 = vld [vmem:[#allocation4 + $0x68] sm:$0xff]  }
 0x1b7   :  { %1553 = vmatprep.mubr.bf16.mxu1 %v3942_v0  ;;  %3421 = vmatprep.mubr.bf16.mxu0 %v4296_v29 }
 0x1b8   :  { %3219 = vmatprep.subr.bf16.mxu0 %v3749_v39 }
 0x1b9   :  { %3220 = vmatpush3.bf16.msra.mxu0 %v3750_v42 }
 0x1ba   :  { %3221 = vmatprep.subr.bf16.mxu0 %v3752_v51 }
 0x1be   :  { %1554 = vmatmul.mubr.bf16.gmra.mrb[72].mxu1 %v4260_v21  ;;  %3422 = vmatmul.mubr.bf16.gmra.mrb[136].mxu0 %v4294_v25  ;;  %v3754_v21 = vld [vmem:[#allocation4 + $0xa0] sm:$0xff]  }
 0x1bf   :  { %1563 = vmatprep.mubr.bf16.mxu1 %v3942_v0  ;;  %3425 = vmatprep.mubr.bf16.mxu0 %v4306_v50 }
 0x1c6   :  { %1564 = vmatmul.mubr.bf16.gmra.mrb[76].mxu1 %v4258_v18  ;;  %3426 = vmatmul.mubr.bf16.gmra.mrb[140].mxu0 %v4304_v49  ;;  %v3751_v18 = vld [vmem:[#allocation4 + $0x98] sm:$0xff]  }
 0x1c7   :  { %1573 = vmatprep.mubr.bf16.mxu1 %v3942_v0  ;;  %3435 = vmatprep.subr.bf16.mxu1 %v3751_v18 }
 0x1c8   :  { %3436 = vmatpush3.bf16.msra.mxu1 %v3751_v18 }
 0x1c9   :  { %3437 = vmatprep.subr.bf16.mxu1 %v3754_v21 }
 0x1cc   :  { %3438 = vmatpush3.bf16.msra.mxu1 %v3754_v21 }
 0x1cd   :  { %3439 = vmatprep.subr.bf16.mxu1 %v3755_v52 }
 0x1ce   :  { %1574 = vmatmul.mubr.bf16.gmra.mrb[80].mxu1 %v4272_v13  ;;  %v3753_v13 = vld [vmem:[#allocation4 + $0x30] sm:$0xff]  }
 0x1cf   :  { %1583 = vmatprep.mubr.bf16.mxu1 %v3942_v0  ;;  %3222 = vmatpush3.bf16.msra.mxu0 %v3753_v13 }
 0x1d0   :  { %3440 = vmatpush3.bf16.msra.mxu1 %v3755_v52  ;;  %3223 = vmatprep.subr.bf16.mxu0 %v3756_v3 }
 0x1d1   :  { %3441 = vmatprep.subr.bf16.mxu1 %v3758_v56 }
 0x1d3   :  { %3224 = vmatpush3.bf16.msra.mxu0 %v3757_v4 }
 0x1d4   :  { %3442 = vmatpush3.bf16.msra.mxu1 %v3758_v56 }
 0x1d6   :  { %1584 = vmatmul.mubr.bf16.gmra.mrb[84].mxu1 %v4270_v57 }
 0x1d7   :  { %1593 = vmatprep.mubr.bf16.mxu1 %v3942_v0 }
 0x1de   :  { %1594 = vmatmul.mubr.bf16.gmra.mrb[88].mxu1 %v4284_v44  ;;  %v3759_v44 = vld [vmem:[#allocation4 + $0xb8] sm:$0xff]  }
 0x1df   :  { %1603 = vmatprep.mubr.bf16.mxu1 %v3942_v0  ;;  %3443 = vmatprep.subr.bf16.mxu1 %v3759_v44 }
 0x1e0   :  { %3444 = vmatpush3.bf16.msra.mxu1 %v3759_v44 }
 0x1e1   :  { %v3089_v54 = vpop.f32.mrb[48].mxu0 }
 0x1e2   :  { %v3090_v57 = vpop.f32.mrb[49].mxu0 }
 0x1e3   :  { %v4361_v58 = vadd.f32 %v3090_v57, %v3089_v54  ;;  %v3092_v59 = vpop.f32.mrb[50].mxu0 }
 0x1e4   :  { %v3093_v62 = vpop.f32.mrb[51].mxu0 }
 0x1e5   :  { %v4363_v2 = vadd.f32 %v3093_v62, %v3092_v59 }
 0x1e6   :  { %1604 = vmatmul.mubr.bf16.gmra.mrb[92].mxu1 %v4282_v41 }
 0x1e7   :  { %1613 = vmatprep.mubr.bf16.mxu1 %v3942_v0 }
 0x1e9   :  { %v3095_v5 = vpop.f32.mrb[52].mxu0 }
 0x1ea   :  { %v3096_v6 = vpop.f32.mrb[53].mxu0 }
 0x1eb   :  { %v4367_v7 = vadd.f32 %v3096_v6, %v3095_v5  ;;  %v3098_v8 = vpop.f32.mrb[54].mxu0 }
 0x1ec   :  { %v3099_v9 = vpop.f32.mrb[55].mxu0 }
 0x1ed   :  { %v4369_v10 = vadd.f32 %v3099_v9, %v3098_v8 }
 0x1ee   :  { %1614 = vmatmul.mubr.bf16.gmra.mrb[96].mxu1 %v4296_v29 }
 0x1ef   :  { %1623 = vmatprep.mubr.bf16.mxu1 %v3942_v0 }
 0x1f1   :  { %v3101_v41 = vpop.f32.mrb[56].mxu0 }
 0x1f2   :  { %v3102_v20 = vpop.f32.mrb[57].mxu0 }
 0x1f3   :  { %v4373_v22 = vadd.f32 %v3102_v20, %v3101_v41  ;;  %v3104_v23 = vpop.f32.mrb[58].mxu0 }
 0x1f4   :  { %v3105_v24 = vpop.f32.mrb[59].mxu0 }
 0x1f5   :  { %v4375_v27 = vadd.f32 %v3105_v24, %v3104_v23 }
 0x1f6   :  { %1624 = vmatmul.mubr.bf16.gmra.mrb[100].mxu1 %v4294_v25 }
 0x1f7   :  { %1633 = vmatprep.mubr.bf16.mxu1 %v3942_v0 }
 0x1f9   :  { %v3107_v15 = vpop.f32.mrb[60].mxu0 }
 0x1fa   :  { %v3108_v31 = vpop.f32.mrb[61].mxu0 }
 0x1fb   :  { %v4379_v32 = vadd.f32 %v3108_v31, %v3107_v15  ;;  %v3110_v33 = vpop.f32.mrb[62].mxu0 }
 0x1fc   :  { %v3111_v29 = vpop.f32.mrb[63].mxu0 }
 0x1fd   :  { %v4381_v34 = vadd.f32 %v3111_v29, %v3110_v33 }
 0x1fe   :  { %1634 = vmatmul.mubr.bf16.gmra.mrb[104].mxu1 %v4306_v50 }
 0x1ff   :  { %1643 = vmatprep.mubr.bf16.mxu1 %v3942_v0 }
 0x201   :  { %v3113_v35 = vpop.f32.mrb[64].mxu0 }
 0x202   :  { %v3114_v16 = vpop.f32.mrb[65].mxu0 }
 0x203   :  { %v4385_v36 = vadd.f32 %v3114_v16, %v3113_v35  ;;  %v3116_v37 = vpop.f32.mrb[66].mxu0 }
 0x204   :  { %v3117_v25 = vpop.f32.mrb[67].mxu0 }
 0x205   :  { %v4387_v43 = vadd.f32 %v3117_v25, %v3116_v37 }
 0x206   :  { %1644 = vmatmul.mubr.bf16.gmra.mrb[108].mxu1 %v4304_v49 }
 0x209   :  { %v3119_v45 = vpop.f32.mrb[68].mxu0 }
 0x20a   :  { %v3120_v46 = vpop.f32.mrb[69].mxu0 }
 0x20b   :  { %v4390_v48 = vadd.f32 %v3120_v46, %v3119_v45  ;;  %v3122_v61 = vpop.f32.mrb[70].mxu0 }
 0x20c   :  { %v3123_v63 = vpop.f32.mrb[71].mxu0 }
 0x20d   :  { %v4392_v38 = vadd.f32 %v3123_v63, %v3122_v61 }
 0x211   :  { %v3125_v50 = vpop.f32.mrb[72].mxu0 }
 0x212   :  { %v3126_v0 = vpop.f32.mrb[73].mxu0 }
 0x213   :  { %v4394_v40 = vadd.f32 %v3126_v0, %v3125_v50  ;;  %v3128_v17 = vpop.f32.mrb[74].mxu0 }
 0x214   :  { %v3129_v19 = vpop.f32.mrb[75].mxu0 }
 0x215   :  { %v4396_v47 = vadd.f32 %v3129_v19, %v3128_v17 }
 0x219   :  { %v3131_v53 = vpop.f32.mrb[76].mxu0 }
 0x21a   :  { %v3132_v55 = vpop.f32.mrb[77].mxu0 }
 0x21b   :  { %v4398_v28 = vadd.f32 %v3132_v55, %v3131_v53  ;;  %v3134_v49 = vpop.f32.mrb[78].mxu0 }
 0x21c   :  { %v3135_v30 = vpop.f32.mrb[79].mxu0 }
 0x21d   :  { %v4400_v60 = vadd.f32 %v3135_v30, %v3134_v49 }
 0x221   :  { %v3137_v1 = vpop.f32.mrb[80].mxu0 }
 0x222   :  { %v3138_v39 = vpop.f32.mrb[81].mxu0 }
 0x223   :  { %v4402_v42 = vadd.f32 %v3138_v39, %v3137_v1  ;;  %v3140_v18 = vpop.f32.mrb[82].mxu0  ;;  %v867_v1 = vld [vmem:[%s4818_s4] sm:$0x7] }
 0x224   :  { %v3141_v21 = vpop.f32.mrb[83].mxu0 }
 0x225   :  { %v4404_v51 = vadd.f32 %v3141_v21, %v3140_v18 }
 0x229   :  { %v3143_v13 = vpop.f32.mrb[84].mxu0 }
 0x22a   :  { %v3144_v52 = vpop.f32.mrb[85].mxu0 }
 0x22b   :  { %v4406_v54 = vadd.f32 %v3144_v52, %v3143_v13  ;;  %v3146_v57 = vpop.f32.mrb[86].mxu0  ;;  %v4439_v52 = vrot.slane %v867_v1, %v107_v26 }
 0x22c   :  { %v3147_v56 = vpop.f32.mrb[87].mxu0 }
 0x22d   :  { %v4408_v59 = vadd.f32 %v3147_v56, %v3146_v57  ;;  %v4443_v57 = vrot.slane %v867_v1, %v99_v12  ;;  %v4447_v56 = vrot.slane %v867_v1, %v103_v14  ;;  %v1700_v12 = vadd.f32 %v4369_v10, %v4439_v52 }
 0x231   :  { %v3149_v62 = vpop.f32.mrb[88].mxu0 }
 0x232   :  { %v3150_v3 = vpop.f32.mrb[89].mxu0 }
 0x233   :  { %v4410_v44 = vadd.f32 %v3150_v3, %v3149_v62  ;;  %v3152_v4 = vpop.f32.mrb[90].mxu0  ;;  %v1697_v62 = vadd.f32 %v4367_v7, %v4439_v52  ;;  %v1692_v7 = vadd.f32 %v4363_v2, %v4439_v52  ;;  %v1713_v2 = vadd.f32 %v4379_v32, %v4439_v52 }
 0x234   :  { %v3153_v5 = vpop.f32.mrb[91].mxu0 }
 0x235   :  { %v4412_v6 = vadd.f32 %v3153_v5, %v3152_v4  ;;  %v1689_v5 = vadd.f32 %v4361_v58, %v4439_v52 }
 0x239   :  { %v3155_v8 = vpop.f32.mrb[92].mxu0 }
 0x23a   :  { %v3156_v9 = vpop.f32.mrb[93].mxu0 }
 0x23b   :  { %v4414_v41 = vadd.f32 %v3156_v9, %v3155_v8  ;;  %v3158_v20 = vpop.f32.mrb[94].mxu0 }
 0x23c   :  { %v3159_v23 = vpop.f32.mrb[95].mxu0 }
 0x23d   :  { %v4416_v24 = vadd.f32 %v3159_v23, %v3158_v20 }
 0x241   :  { %v3161_v15 = vpop.f32.mrb[96].mxu0 }
 0x242   :  { %v3162_v31 = vpop.f32.mrb[97].mxu0 }
 0x243   :  { %v4418_v33 = vadd.f32 %v3162_v31, %v3161_v15  ;;  %v3164_v29 = vpop.f32.mrb[98].mxu0 }
 0x244   :  { %v3165_v35 = vpop.f32.mrb[99].mxu0 }
 0x245   :  { %v4420_v16 = vadd.f32 %v3165_v35, %v3164_v29 }
 0x249   :  { %v3167_v37 = vpop.f32.mrb[100].mxu0 }
 0x24a   :  { %v3168_v25 = vpop.f32.mrb[101].mxu0 }
 0x24b   :  { %v4422_v45 = vadd.f32 %v3168_v25, %v3167_v37  ;;  %v3170_v46 = vpop.f32.mrb[102].mxu0 }
 0x24c   :  { %v3171_v61 = vpop.f32.mrb[103].mxu0 }
 0x24d   :  { %v4424_v63 = vadd.f32 %v3171_v61, %v3170_v46 }
 0x251   :  { %v3173_v50 = vpop.f32.mrb[104].mxu0 }
 0x252   :  { %v3174_v0 = vpop.f32.mrb[105].mxu0 }
 0x253   :  { %v4426_v17 = vadd.f32 %v3174_v0, %v3173_v50  ;;  %v3176_v19 = vpop.f32.mrb[106].mxu0 }
 0x254   :  { %v3177_v53 = vpop.f32.mrb[107].mxu0 }
 0x255   :  { %v4428_v55 = vadd.f32 %v3177_v53, %v3176_v19 }
 0x259   :  { %v3179_v49 = vpop.f32.mrb[108].mxu0 }
 0x25a   :  { %v3180_v30 = vpop.f32.mrb[109].mxu0 }
 0x25b   :  { %v4433_v39 = vadd.f32 %v3180_v30, %v3179_v49  ;;  %v3182_v18 = vpop.f32.mrb[110].mxu0 }
 0x25c   :  { %v3183_v21 = vpop.f32.mrb[111].mxu0 }
 0x25d   :  { %v4435_v13 = vadd.f32 %v3183_v21, %v3182_v18 }
 0x261   :  { %v1495_v3 = vpop.f32.mrb[48].mxu1  ;;  %v3399_v4 = vpop.f32.mrb[112].mxu0 }
 0x262   :  { %v3481_v8 = vadd.f32 %v1495_v3, %v4443_v57  ;;  %v1858_v26 = vadd.f32 %v3399_v4, %v1697_v62  ;;  %v1497_v9 = vpop.f32.mrb[49].mxu1  ;;  %v1849_v20 = vpop.f32.mrb[113].mxu0  ;;  %v1705_v4 = vadd.f32 %v4373_v22, %v4439_v52 }
 0x263   :  { %v3482_v11 = vadd.f32 %v1497_v9, %v4447_v56  ;;  %v1850_v14 = vadd.f32 %v1849_v20, %v1689_v5  ;;  %v1499_v23 = vpop.f32.mrb[50].mxu1  ;;  %v3400_v15 = vpop.f32.mrb[114].mxu0  ;;  %v1716_v20 = vadd.f32 %v4381_v34, %v4439_v52 }
 0x264   :  { %v3483_v31 = vadd.f32 %v1499_v23, %v4443_v57  ;;  %v1861_v29 = vadd.f32 %v3400_v15, %v1700_v12  ;;  %v1501_v58 = vpop.f32.mrb[51].mxu1  ;;  %v1852_v35 = vpop.f32.mrb[115].mxu0  ;;  %v1976_v46 = vmax.f32 %v3481_v8, 0.0  ;;  %v1984_v61 = vmax.f32 %v1858_v26, 0.0 }
 0x265   :  { %v3484_v37 = vadd.f32 %v1501_v58, %v4447_v56  ;;  %v1853_v25 = vadd.f32 %v1852_v35, %v1692_v7  ;;  %v1977_v0 = vmax.f32 %v3482_v11, 0.0  ;;  %v1978_v19 = vmax.f32 %v1850_v14, 0.0 }
 0x266   :  { %v1979_v50 = vmax.f32 %v3483_v31, 0.0  ;;  %v1987_v10 = vmax.f32 %v1861_v29, 0.0  ;;  %v1708_v23 = vadd.f32 %v4375_v27, %v4439_v52 }
 0x267   :  { %v1980_v53 = vmax.f32 %v3484_v37, 0.0  ;;  %v1981_v49 = vmax.f32 %v1853_v25, 0.0 }
 0x268   :  { %v2072_v30 = vpack.c.bf16 %v1979_v50, %v1976_v46  ;;  %v2077_v1 = vpack.c.bf16 %v1987_v10, %v1984_v61 }
 0x269   :  { %v2073_v18 = vpack.c.bf16 %v1980_v53, %v1977_v0  ;;  %v2074_v21 = vpack.c.bf16 %v1981_v49, %v1978_v19  ;;  %v1505_v62 = vpop.f32.mrb[52].mxu1  ;;  %v3403_v3 = vpop.f32.mrb[116].mxu0  ;;  %v1729_v19 = vadd.f32 %v4390_v48, %v4439_v52 }
 0x26a   :  { %v3485_v5 = vadd.f32 %v1505_v62, %v4443_v57  ;;  %v1874_v8 = vadd.f32 %v3403_v3, %v1713_v2  ;;  %v1507_v26 = vpop.f32.mrb[53].mxu1  ;;  %v1865_v9 = vpop.f32.mrb[117].mxu0  ;;  %v1721_v2 = vadd.f32 %v4385_v36, %v4439_v52 }
 0x26b   :  { %v3486_v12 = vadd.f32 %v1507_v26, %v4447_v56  ;;  %v1866_v11 = vadd.f32 %v1865_v9, %v1705_v4  ;;  %v1509_v14 = vpop.f32.mrb[54].mxu1  ;;  %v3404_v32 = vpop.f32.mrb[118].mxu0  ;;  %2351 = vmatprep.mubr.bf16.mxu0 %v2073_v18  ;;  %3445 = vmatprep.mubr.bf16.mxu1 %v2074_v21  ;;  %v1732_v4 = vadd.f32 %v4392_v38, %v4439_v52 }
 0x26c   :  { %v3487_v22 = vadd.f32 %v1509_v14, %v4443_v57  ;;  %v1877_v15 = vadd.f32 %v3404_v32, %v1716_v20  ;;  %v1511_v7 = vpop.f32.mrb[55].mxu1  ;;  %v1868_v31 = vpop.f32.mrb[119].mxu0  ;;  %2352 = vmatmul.mubr.bf16.vlgmr.msra.gmra.mrb[144].mxu0 %v2072_v30  ;;  %3446 = vmatmul.mubr.bf16.vlgmr.msra.gmra.mrb[112].mxu1 %v2077_v1  ;;  %v1982_v58 = vmax.f32 %v3485_v5, 0.0  ;;  %v1996_v35 = vmax.f32 %v1874_v8, 0.0 }
 0x26d   :  { %v3488_v29 = vadd.f32 %v1511_v7, %v4447_v56  ;;  %v1869_v34 = vadd.f32 %v1868_v31, %v1708_v23  ;;  %v1983_v46 = vmax.f32 %v3486_v12, 0.0  ;;  %v1990_v61 = vmax.f32 %v1866_v11, 0.0 }
 0x26e   :  { %v1985_v37 = vmax.f32 %v3487_v22, 0.0  ;;  %v1999_v25 = vmax.f32 %v1877_v15, 0.0  ;;  %v1724_v9 = vadd.f32 %v4387_v43, %v4439_v52 }
 0x26f   :  { %v1986_v50 = vmax.f32 %v3488_v29, 0.0  ;;  %v1993_v10 = vmax.f32 %v1869_v34, 0.0 }
 0x270   :  { %v2075_v0 = vpack.c.bf16 %v1985_v37, %v1982_v58  ;;  %v2083_v27 = vpack.c.bf16 %v1999_v25, %v1996_v35  ;;  %v1745_v35 = vadd.f32 %v4398_v28, %v4439_v52 }
 0x271   :  { %v2076_v53 = vpack.c.bf16 %v1986_v50, %v1983_v46  ;;  %v2080_v49 = vpack.c.bf16 %v1993_v10, %v1990_v61  ;;  %v1515_v30 = vpop.f32.mrb[56].mxu1  ;;  %v3407_v1 = vpop.f32.mrb[120].mxu0  ;;  %v1737_v50 = vadd.f32 %v4394_v40, %v4439_v52 }
 0x272   :  { %v3489_v18 = vadd.f32 %v1515_v30, %v4443_v57  ;;  %v1890_v21 = vadd.f32 %v3407_v1, %v1729_v19  ;;  %v1517_v62 = vpop.f32.mrb[57].mxu1  ;;  %v1881_v3 = vpop.f32.mrb[121].mxu0 }
 0x273   :  { %v3490_v5 = vadd.f32 %v1517_v62, %v4447_v56  ;;  %v1882_v8 = vadd.f32 %v1881_v3, %v1721_v2  ;;  %v1519_v26 = vpop.f32.mrb[58].mxu1  ;;  %v3408_v48 = vpop.f32.mrb[122].mxu0  ;;  %2359 = vmatprep.mubr.bf16.mxu0 %v2076_v53  ;;  %3449 = vmatprep.mubr.bf16.mxu1 %v2080_v49  ;;  %v1748_v53 = vadd.f32 %v4400_v60, %v4439_v52 }
 0x274   :  { %v3491_v36 = vadd.f32 %v1519_v26, %v4443_v57  ;;  %v1893_v20 = vadd.f32 %v3408_v48, %v1732_v4  ;;  %v1521_v12 = vpop.f32.mrb[59].mxu1  ;;  %v1884_v11 = vpop.f32.mrb[123].mxu0  ;;  %2360 = vmatmul.mubr.bf16.gmra.mrb[148].mxu0 %v2075_v0  ;;  %3450 = vmatmul.mubr.bf16.gmra.mrb[116].mxu1 %v2083_v27  ;;  %v1988_v32 = vmax.f32 %v3489_v18, 0.0  ;;  %v2008_v23 = vmax.f32 %v1890_v21, 0.0 }
 0x275   :  { %v3492_v14 = vadd.f32 %v1521_v12, %v4447_v56  ;;  %v1885_v38 = vadd.f32 %v1884_v11, %v1724_v9  ;;  %v1989_v7 = vmax.f32 %v3490_v5, 0.0  ;;  %v2002_v31 = vmax.f32 %v1882_v8, 0.0 }
 0x276   :  { %v1991_v22 = vmax.f32 %v3491_v36, 0.0  ;;  %v2011_v15 = vmax.f32 %v1893_v20, 0.0  ;;  %v1740_v2 = vadd.f32 %v4396_v47, %v4439_v52  ;;  %v1761_v11 = vadd.f32 %v4406_v54, %v4439_v52 }
 0x277   :  { %v1992_v29 = vmax.f32 %v3492_v14, 0.0  ;;  %v2005_v34 = vmax.f32 %v1885_v38, 0.0 }
 0x278   :  { %v2078_v58 = vpack.c.bf16 %v1991_v22, %v1988_v32  ;;  %v2089_v43 = vpack.c.bf16 %v2011_v15, %v2008_v23  ;;  %v1753_v22 = vadd.f32 %v4402_v42, %v4439_v52 }
 0x279   :  { %v2079_v37 = vpack.c.bf16 %v1992_v29, %v1989_v7  ;;  %v2086_v25 = vpack.c.bf16 %v2005_v34, %v2002_v31  ;;  %v1525_v46 = vpop.f32.mrb[60].mxu1  ;;  %v3411_v61 = vpop.f32.mrb[124].mxu0  ;;  %v1764_v34 = vadd.f32 %v4408_v59, %v4439_v52 }
 0x27a   :  { %v3493_v10 = vadd.f32 %v1525_v46, %v4443_v57  ;;  %v1906_v0 = vadd.f32 %v3411_v61, %v1745_v35  ;;  %v1527_v27 = vpop.f32.mrb[61].mxu1  ;;  %v1897_v19 = vpop.f32.mrb[125].mxu0 }
 0x27b   :  { %v3494_v49 = vadd.f32 %v1527_v27, %v4447_v56  ;;  %v1898_v30 = vadd.f32 %v1897_v19, %v1737_v50  ;;  %v1529_v1 = vpop.f32.mrb[62].mxu1  ;;  %v3412_v28 = vpop.f32.mrb[126].mxu0  ;;  %2367 = vmatprep.mubr.bf16.mxu0 %v2079_v37  ;;  %3453 = vmatprep.mubr.bf16.mxu1 %v2086_v25  ;;  %v1756_v37 = vadd.f32 %v4404_v51, %v4439_v52 }
 0x27c   :  { %v3495_v40 = vadd.f32 %v1529_v1, %v4443_v57  ;;  %v1909_v18 = vadd.f32 %v3412_v28, %v1748_v53  ;;  %v1531_v21 = vpop.f32.mrb[63].mxu1  ;;  %v1900_v62 = vpop.f32.mrb[127].mxu0  ;;  %2368 = vmatmul.mubr.bf16.gmra.mrb[152].mxu0 %v2078_v58  ;;  %3454 = vmatmul.mubr.bf16.gmra.mrb[120].mxu1 %v2089_v43  ;;  %v1994_v4 = vmax.f32 %v3493_v10, 0.0  ;;  %v2020_v5 = vmax.f32 %v1906_v0, 0.0 }
 0x27d   :  { %v3496_v3 = vadd.f32 %v1531_v21, %v4447_v56  ;;  %v1901_v60 = vadd.f32 %v1900_v62, %v1740_v2  ;;  %v1995_v48 = vmax.f32 %v3494_v49, 0.0  ;;  %v2014_v9 = vmax.f32 %v1898_v30, 0.0 }
 0x27e   :  { %v1997_v8 = vmax.f32 %v3495_v40, 0.0  ;;  %v2023_v26 = vmax.f32 %v1909_v18, 0.0  ;;  %v1777_v2 = vadd.f32 %v4414_v41, %v4439_v52 }
 0x27f   :  { %v1998_v36 = vmax.f32 %v3496_v3, 0.0  ;;  %v2017_v20 = vmax.f32 %v1901_v60, 0.0  ;;  %v1769_v3 = vadd.f32 %v4410_v44, %v4439_v52 }
 0x280   :  { %v2081_v12 = vpack.c.bf16 %v1997_v8, %v1994_v4  ;;  %v2095_v47 = vpack.c.bf16 %v2023_v26, %v2020_v5  ;;  %v1780_v26 = vadd.f32 %v4416_v24, %v4439_v52 }
 0x281   :  { %v2082_v14 = vpack.c.bf16 %v1998_v36, %v1995_v48  ;;  %v2092_v38 = vpack.c.bf16 %v2017_v20, %v2014_v9  ;;  %v1535_v32 = vpop.f32.mrb[64].mxu1  ;;  %v3415_v23 = vpop.f32.mrb[128].mxu0  ;;  %v1772_v20 = vadd.f32 %v4412_v6, %v4439_v52 }
 0x282   :  { %v3497_v15 = vadd.f32 %v1535_v32, %v4443_v57  ;;  %v1922_v7 = vadd.f32 %v3415_v23, %v1761_v11  ;;  %v1537_v31 = vpop.f32.mrb[65].mxu1  ;;  %v1913_v29 = vpop.f32.mrb[129].mxu0 }
 0x283   :  { %v3498_v58 = vadd.f32 %v1537_v31, %v4447_v56  ;;  %v1914_v43 = vadd.f32 %v1913_v29, %v1753_v22  ;;  %v1539_v35 = vpop.f32.mrb[66].mxu1  ;;  %v3416_v54 = vpop.f32.mrb[130].mxu0  ;;  %2375 = vmatprep.mubr.bf16.mxu0 %v2082_v14  ;;  %3457 = vmatprep.mubr.bf16.mxu1 %v2092_v38 }
 0x284   :  { %v3499_v42 = vadd.f32 %v1539_v35, %v4443_v57  ;;  %v1925_v25 = vadd.f32 %v3416_v54, %v1764_v34  ;;  %v1541_v46 = vpop.f32.mrb[67].mxu1  ;;  %v1916_v61 = vpop.f32.mrb[131].mxu0  ;;  %2376 = vmatmul.mubr.bf16.gmra.mrb[156].mxu0 %v2081_v12  ;;  %3458 = vmatmul.mubr.bf16.gmra.mrb[124].mxu1 %v2095_v47  ;;  %v2000_v10 = vmax.f32 %v3497_v15, 0.0  ;;  %v2032_v0 = vmax.f32 %v1922_v7, 0.0 }
 0x285   :  { %v3500_v50 = vadd.f32 %v1541_v46, %v4447_v56  ;;  %v1917_v59 = vadd.f32 %v1916_v61, %v1756_v37  ;;  %v2001_v53 = vmax.f32 %v3498_v58, 0.0  ;;  %v2026_v49 = vmax.f32 %v1914_v43, 0.0 }
 0x286   :  { %v2003_v27 = vmax.f32 %v3499_v42, 0.0  ;;  %v2035_v19 = vmax.f32 %v1925_v25, 0.0  ;;  %v1793_v58 = vadd.f32 %v4422_v45, %v4439_v52  ;;  %v1785_v42 = vadd.f32 %v4418_v33, %v4439_v52 }
 0x287   :  { %v2004_v30 = vmax.f32 %v3500_v50, 0.0  ;;  %v2029_v1 = vmax.f32 %v1917_v59, 0.0  ;;  %v1796_v59 = vadd.f32 %v4424_v63, %v4439_v52 }
 0x288   :  { %v2084_v28 = vpack.c.bf16 %v2003_v27, %v2000_v10  ;;  %v2101_v51 = vpack.c.bf16 %v2035_v19, %v2032_v0  ;;  %v1788_v19 = vadd.f32 %v4420_v16, %v4439_v52 }
 0x289   :  { %v2085_v40 = vpack.c.bf16 %v2004_v30, %v2001_v53  ;;  %v2098_v18 = vpack.c.bf16 %v2029_v1, %v2026_v49  ;;  %v1545_v21 = vpop.f32.mrb[68].mxu1  ;;  %v3419_v62 = vpop.f32.mrb[132].mxu0 }
 0x28a   :  { %v3501_v60 = vadd.f32 %v1545_v21, %v4443_v57  ;;  %v1938_v4 = vadd.f32 %v3419_v62, %v1777_v2  ;;  %v1547_v5 = vpop.f32.mrb[69].mxu1  ;;  %v1929_v8 = vpop.f32.mrb[133].mxu0 }
 0x28b   :  { %v3502_v48 = vadd.f32 %v1547_v5, %v4447_v56  ;;  %v1930_v9 = vadd.f32 %v1929_v8, %v1769_v3  ;;  %v1549_v36 = vpop.f32.mrb[70].mxu1  ;;  %v3420_v41 = vpop.f32.mrb[134].mxu0  ;;  %2383 = vmatprep.mubr.bf16.mxu0 %v2085_v40  ;;  %3461 = vmatprep.mubr.bf16.mxu1 %v2098_v18 }
 0x28c   :  { %v3503_v44 = vadd.f32 %v1549_v36, %v4443_v57  ;;  %v1941_v12 = vadd.f32 %v3420_v41, %v1780_v26  ;;  %v1551_v47 = vpop.f32.mrb[71].mxu1  ;;  %v1932_v11 = vpop.f32.mrb[135].mxu0  ;;  %2384 = vmatmul.mubr.bf16.gmra.mrb[160].mxu0 %v2084_v28  ;;  %3462 = vmatmul.mubr.bf16.gmra.mrb[128].mxu1 %v2101_v51  ;;  %v2006_v38 = vmax.f32 %v3501_v60, 0.0  ;;  %v2044_v32 = vmax.f32 %v1938_v4, 0.0 }
 0x28d   :  { %v3504_v14 = vadd.f32 %v1551_v47, %v4447_v56  ;;  %v1933_v24 = vadd.f32 %v1932_v11, %v1772_v20  ;;  %v2007_v15 = vmax.f32 %v3502_v48, 0.0  ;;  %v2038_v7 = vmax.f32 %v1930_v9, 0.0 }
 0x28e   :  { %v2009_v23 = vmax.f32 %v3503_v44, 0.0  ;;  %v2047_v22 = vmax.f32 %v1941_v12, 0.0  ;;  %v1809_v4 = vadd.f32 %v4433_v39, %v4439_v52  ;;  %v1801_v9 = vadd.f32 %v4426_v17, %v4439_v52 }
 0x28f   :  { %v2010_v31 = vmax.f32 %v3504_v14, 0.0  ;;  %v2041_v29 = vmax.f32 %v1933_v24, 0.0  ;;  %v1812_v12 = vadd.f32 %v4435_v13, %v4439_v52  ;;  %v1804_v24 = vadd.f32 %v4428_v55, %v4439_v52 }
 0x290   :  { %v2087_v34 = vpack.c.bf16 %v2009_v23, %v2006_v38  ;;  %v2107_v6 = vpack.c.bf16 %v2047_v22, %v2044_v32 }
 0x291   :  { %v2088_v43 = vpack.c.bf16 %v2010_v31, %v2007_v15  ;;  %v2104_v35 = vpack.c.bf16 %v2041_v29, %v2038_v7  ;;  %v1555_v54 = vpop.f32.mrb[72].mxu1  ;;  %v3423_v37 = vpop.f32.mrb[136].mxu0 }
 0x292   :  { %v3505_v25 = vadd.f32 %v1555_v54, %v4443_v57  ;;  %v1954_v46 = vadd.f32 %v3423_v37, %v1793_v58  ;;  %v1557_v61 = vpop.f32.mrb[73].mxu1  ;;  %v1945_v50 = vpop.f32.mrb[137].mxu0 }
 0x293   :  { %v3506_v10 = vadd.f32 %v1557_v61, %v4447_v56  ;;  %v1946_v0 = vadd.f32 %v1945_v50, %v1785_v42  ;;  %v1559_v27 = vpop.f32.mrb[74].mxu1  ;;  %v3424_v45 = vpop.f32.mrb[138].mxu0  ;;  %2391 = vmatprep.mubr.bf16.mxu0 %v2088_v43  ;;  %3465 = vmatprep.mubr.bf16.mxu1 %v2104_v35 }
 0x294   :  { %v3507_v33 = vadd.f32 %v1559_v27, %v4443_v57  ;;  %v1957_v53 = vadd.f32 %v3424_v45, %v1796_v59  ;;  %v1561_v49 = vpop.f32.mrb[75].mxu1  ;;  %v1948_v30 = vpop.f32.mrb[139].mxu0  ;;  %2392 = vmatmul.mubr.bf16.gmra.mrb[164].mxu0 %v2087_v34  ;;  %3466 = vmatmul.mubr.bf16.gmra.mrb[132].mxu1 %v2107_v6  ;;  %v2012_v28 = vmax.f32 %v3505_v25, 0.0  ;;  %v2056_v51 = vmax.f32 %v1954_v46, 0.0 }
 0x295   :  { %v3508_v1 = vadd.f32 %v1561_v49, %v4447_v56  ;;  %v1949_v63 = vadd.f32 %v1948_v30, %v1788_v19  ;;  %v2013_v18 = vmax.f32 %v3506_v10, 0.0  ;;  %v2050_v21 = vmax.f32 %v1946_v0, 0.0 }
 0x296   :  { %v2015_v2 = vmax.f32 %v3507_v33, 0.0  ;;  %v2059_v40 = vmax.f32 %v1957_v53, 0.0 }
 0x297   :  { %v2016_v62 = vmax.f32 %v3508_v1, 0.0  ;;  %v2053_v3 = vmax.f32 %v1949_v63, 0.0 }
 0x298   :  { %v2090_v60 = vpack.c.bf16 %v2015_v2, %v2012_v28  ;;  %v2113_v16 = vpack.c.bf16 %v2059_v40, %v2056_v51 }
 0x299   :  { %v2091_v5 = vpack.c.bf16 %v2016_v62, %v2013_v18  ;;  %v2110_v8 = vpack.c.bf16 %v2053_v3, %v2050_v21  ;;  %v1565_v26 = vpop.f32.mrb[76].mxu1  ;;  %v3427_v48 = vpop.f32.mrb[140].mxu0 }
 0x29a   :  { %v3509_v36 = vadd.f32 %v1565_v26, %v4443_v57  ;;  %v1970_v41 = vadd.f32 %v3427_v48, %v1809_v4  ;;  %v1567_v20 = vpop.f32.mrb[77].mxu1  ;;  %v1961_v44 = vpop.f32.mrb[141].mxu0 }
 0x29b   :  { %v3510_v47 = vadd.f32 %v1567_v20, %v4447_v56  ;;  %v1962_v11 = vadd.f32 %v1961_v44, %v1801_v9  ;;  %v1569_v14 = vpop.f32.mrb[78].mxu1  ;;  %v3428_v39 = vpop.f32.mrb[142].mxu0  ;;  %2399 = vmatprep.mubr.bf16.mxu0 %v2091_v5  ;;  %3469 = vmatprep.mubr.bf16.mxu1 %v2110_v8 }
 0x29c   :  { %v3511_v17 = vadd.f32 %v1569_v14, %v4443_v57  ;;  %v1973_v38 = vadd.f32 %v3428_v39, %v1812_v12  ;;  %v1571_v32 = vpop.f32.mrb[79].mxu1  ;;  %v1964_v23 = vpop.f32.mrb[143].mxu0  ;;  %2400 = vmatmul.mubr.bf16.gmra.mrb[168].mxu0 %v2090_v60  ;;  %3470 = vmatmul.mubr.bf16.gmra.mrb[136].mxu1 %v2113_v16  ;;  %v2018_v15 = vmax.f32 %v3509_v36, 0.0  ;;  %v2068_v7 = vmax.f32 %v1970_v41, 0.0 }
 0x29d   :  { %v3512_v22 = vadd.f32 %v1571_v32, %v4447_v56  ;;  %v1965_v13 = vadd.f32 %v1964_v23, %v1804_v24  ;;  %v2019_v34 = vmax.f32 %v3510_v47, 0.0  ;;  %v2062_v6 = vmax.f32 %v1962_v11, 0.0 }
 0x29e   :  { %v2021_v31 = vmax.f32 %v3511_v17, 0.0  ;;  %v2071_v29 = vmax.f32 %v1973_v38, 0.0 }
 0x29f   :  { %v2022_v58 = vmax.f32 %v3512_v22, 0.0  ;;  %v2065_v43 = vmax.f32 %v1965_v13, 0.0 }
 0x2a0   :  { %v2093_v35 = vpack.c.bf16 %v2021_v31, %v2018_v15  ;;  %v2119_v55 = vpack.c.bf16 %v2071_v29, %v2068_v7 }
 0x2a1   :  { %v2094_v52 = vpack.c.bf16 %v2022_v58, %v2019_v34  ;;  %v2116_v54 = vpack.c.bf16 %v2065_v43, %v2062_v6  ;;  %v1575_v37 = vpop.f32.mrb[80].mxu1 }
 0x2a2   :  { %v3513_v42 = vadd.f32 %v1575_v37, %v4443_v57  ;;  %v1577_v25 = vpop.f32.mrb[81].mxu1 }
 0x2a3   :  { %v3514_v46 = vadd.f32 %v1577_v25, %v4447_v56  ;;  %v1579_v61 = vpop.f32.mrb[82].mxu1  ;;  %2407 = vmatprep.mubr.bf16.mxu0 %v2094_v52  ;;  %3473 = vmatprep.mubr.bf16.mxu1 %v2116_v54 }
 0x2a4   :  { %v3515_v50 = vadd.f32 %v1579_v61, %v4443_v57  ;;  %v1581_v59 = vpop.f32.mrb[83].mxu1  ;;  %2408 = vmatmul.mubr.bf16.gmra.mrb[172].mxu0 %v2093_v35  ;;  %3474 = vmatmul.mubr.bf16.gmra.mrb[140].mxu1 %v2119_v55  ;;  %v2024_v0 = vmax.f32 %v3513_v42, 0.0 }
 0x2a5   :  { %v3516_v10 = vadd.f32 %v1581_v59, %v4447_v56  ;;  %v2025_v45 = vmax.f32 %v3514_v46, 0.0 }
 0x2a6   :  { %v2027_v27 = vmax.f32 %v3515_v50, 0.0 }
 0x2a7   :  { %v2028_v19 = vmax.f32 %v3516_v10, 0.0 }
 0x2a8   :  { %v2096_v33 = vpack.c.bf16 %v2027_v27, %v2024_v0 }
 0x2a9   :  { %v2097_v53 = vpack.c.bf16 %v2028_v19, %v2025_v45  ;;  %v1585_v49 = vpop.f32.mrb[84].mxu1 }
 0x2aa   :  { %v3517_v30 = vadd.f32 %v1585_v49, %v4443_v57  ;;  %v1587_v1 = vpop.f32.mrb[85].mxu1 }
 0x2ab   :  { %v3518_v63 = vadd.f32 %v1587_v1, %v4447_v56  ;;  %v1589_v28 = vpop.f32.mrb[86].mxu1  ;;  %2415 = vmatprep.mubr.bf16.mxu0 %v2097_v53 }
 0x2ac   :  { %v3519_v51 = vadd.f32 %v1589_v28, %v4443_v57  ;;  %v1591_v2 = vpop.f32.mrb[87].mxu1  ;;  %2416 = vmatmul.mubr.bf16.gmra.mrb[176].mxu0 %v2096_v33  ;;  %v2030_v18 = vmax.f32 %v3517_v30, 0.0 }
 0x2ad   :  { %v3520_v40 = vadd.f32 %v1591_v2, %v4447_v56  ;;  %v2031_v62 = vmax.f32 %v3518_v63, 0.0 }
 0x2ae   :  { %v2033_v21 = vmax.f32 %v3519_v51, 0.0 }
 0x2af   :  { %v2034_v3 = vmax.f32 %v3520_v40, 0.0 }
 0x2b0   :  { %v2099_v60 = vpack.c.bf16 %v2033_v21, %v2030_v18 }
 0x2b1   :  { %v2100_v16 = vpack.c.bf16 %v2034_v3, %v2031_v62  ;;  %v1595_v4 = vpop.f32.mrb[88].mxu1 }
 0x2b2   :  { %v3521_v5 = vadd.f32 %v1595_v4, %v4443_v57  ;;  %v1597_v8 = vpop.f32.mrb[89].mxu1 }
 0x2b3   :  { %v3522_v26 = vadd.f32 %v1597_v8, %v4447_v56  ;;  %v1599_v48 = vpop.f32.mrb[90].mxu1  ;;  %2423 = vmatprep.mubr.bf16.mxu0 %v2100_v16 }
 0x2b4   :  { %v3523_v9 = vadd.f32 %v1599_v48, %v4443_v57  ;;  %v1601_v36 = vpop.f32.mrb[91].mxu1  ;;  %2424 = vmatmul.mubr.bf16.gmra.mrb[180].mxu0 %v2099_v60  ;;  %v2036_v20 = vmax.f32 %v3521_v5, 0.0 }
 0x2b5   :  { %v3524_v41 = vadd.f32 %v1601_v36, %v4447_v56  ;;  %v2037_v12 = vmax.f32 %v3522_v26, 0.0 }
 0x2b6   :  { %v2039_v44 = vmax.f32 %v3523_v9, 0.0 }
 0x2b7   :  { %v2040_v47 = vmax.f32 %v3524_v41, 0.0 }
 0x2b8   :  { %v2102_v11 = vpack.c.bf16 %v2039_v44, %v2036_v20 }
 0x2b9   :  { %v2103_v14 = vpack.c.bf16 %v2040_v47, %v2037_v12  ;;  %v1605_v39 = vpop.f32.mrb[92].mxu1 }
 0x2ba   :  { %v3525_v24 = vadd.f32 %v1605_v39, %v4443_v57  ;;  %v1607_v17 = vpop.f32.mrb[93].mxu1 }
 0x2bb   :  { %v3526_v38 = vadd.f32 %v1607_v17, %v4447_v56  ;;  %v1609_v32 = vpop.f32.mrb[94].mxu1  ;;  %2431 = vmatprep.mubr.bf16.mxu0 %v2103_v14 }
 0x2bc   :  { %v3527_v23 = vadd.f32 %v1609_v32, %v4443_v57  ;;  %v1611_v22 = vpop.f32.mrb[95].mxu1  ;;  %2432 = vmatmul.mubr.bf16.gmra.mrb[184].mxu0 %v2102_v11  ;;  %v2042_v15 = vmax.f32 %v3525_v24, 0.0 }
 0x2bd   :  { %v3528_v13 = vadd.f32 %v1611_v22, %v4447_v56  ;;  %v2043_v31 = vmax.f32 %v3526_v38, 0.0 }
 0x2be   :  { %v2045_v7 = vmax.f32 %v3527_v23, 0.0 }
 0x2bf   :  { %v2046_v29 = vmax.f32 %v3528_v13, 0.0 }
 0x2c0   :  { %v2105_v34 = vpack.c.bf16 %v2045_v7, %v2042_v15 }
 0x2c1   :  { %v2106_v6 = vpack.c.bf16 %v2046_v29, %v2043_v31  ;;  %v1615_v58 = vpop.f32.mrb[96].mxu1  ;;  %v4580_v29 = vld [vmem:[%s4820_s6] ss:$0 sm:$0xff] }
 0x2c2   :  { %v3529_v43 = vadd.f32 %v1615_v58, %v4443_v57  ;;  %v1617_v35 = vpop.f32.mrb[97].mxu1 }
 0x2c3   :  { %v3530_v55 = vadd.f32 %v1617_v35, %v4447_v56  ;;  %v1619_v52 = vpop.f32.mrb[98].mxu1  ;;  %2439 = vmatprep.mubr.bf16.mxu0 %v2106_v6 }
 0x2c4   :  { %v3531_v54 = vadd.f32 %v1619_v52, %v4443_v57  ;;  %v1621_v37 = vpop.f32.mrb[99].mxu1  ;;  %2440 = vmatmul.mubr.bf16.gmra.mrb[188].mxu0 %v2105_v34  ;;  %v2048_v25 = vmax.f32 %v3529_v43, 0.0 }
 0x2c5   :  { %v3532_v42 = vadd.f32 %v1621_v37, %v4447_v56  ;;  %v2049_v61 = vmax.f32 %v3530_v55, 0.0 }
 0x2c6   :  { %v2051_v46 = vmax.f32 %v3531_v54, 0.0 }
 0x2c7   :  { %v2052_v50 = vmax.f32 %v3532_v42, 0.0 }
 0x2c8   :  { %v2108_v59 = vpack.c.bf16 %v2051_v46, %v2048_v25 }
 0x2c9   :  { %v2109_v10 = vpack.c.bf16 %v2052_v50, %v2049_v61  ;;  %v1625_v0 = vpop.f32.mrb[100].mxu1 }
 0x2ca   :  { %v3533_v27 = vadd.f32 %v1625_v0, %v4443_v57  ;;  %v1627_v45 = vpop.f32.mrb[101].mxu1 }
 0x2cb   :  { %v3534_v19 = vadd.f32 %v1627_v45, %v4447_v56  ;;  %v1629_v33 = vpop.f32.mrb[102].mxu1  ;;  %2447 = vmatprep.mubr.bf16.mxu0 %v2109_v10 }
 0x2cc   :  { %v3535_v53 = vadd.f32 %v1629_v33, %v4443_v57  ;;  %v1631_v49 = vpop.f32.mrb[103].mxu1  ;;  %2448 = vmatmul.mubr.bf16.gmra.mrb[192].mxu0 %v2108_v59  ;;  %v2054_v1 = vmax.f32 %v3533_v27, 0.0 }
 0x2cd   :  { %v3536_v30 = vadd.f32 %v1631_v49, %v4447_v56  ;;  %v2055_v28 = vmax.f32 %v3534_v19, 0.0 }
 0x2ce   :  { %v2057_v63 = vmax.f32 %v3535_v53, 0.0 }
 0x2cf   :  { %v2058_v51 = vmax.f32 %v3536_v30, 0.0 }
 0x2d0   :  { %v2111_v2 = vpack.c.bf16 %v2057_v63, %v2054_v1 }
 0x2d1   :  { %v2112_v40 = vpack.c.bf16 %v2058_v51, %v2055_v28  ;;  %v1635_v18 = vpop.f32.mrb[104].mxu1 }
 0x2d2   :  { %v3537_v21 = vadd.f32 %v1635_v18, %v4443_v57  ;;  %v1637_v62 = vpop.f32.mrb[105].mxu1 }
 0x2d3   :  { %v3538_v3 = vadd.f32 %v1637_v62, %v4447_v56  ;;  %v1639_v60 = vpop.f32.mrb[106].mxu1  ;;  %2455 = vmatprep.mubr.bf16.mxu0 %v2112_v40 }
 0x2d4   :  { %v3539_v16 = vadd.f32 %v1639_v60, %v4443_v57  ;;  %v1641_v4 = vpop.f32.mrb[107].mxu1  ;;  %2456 = vmatmul.mubr.bf16.gmra.mrb[196].mxu0 %v2111_v2  ;;  %v2060_v8 = vmax.f32 %v3537_v21, 0.0 }
 0x2d5   :  { %v3540_v5 = vadd.f32 %v1641_v4, %v4447_v56  ;;  %v2061_v48 = vmax.f32 %v3538_v3, 0.0 }
 0x2d6   :  { %v2063_v26 = vmax.f32 %v3539_v16, 0.0 }
 0x2d7   :  { %v2064_v9 = vmax.f32 %v3540_v5, 0.0 }
 0x2d8   :  { %v2114_v36 = vpack.c.bf16 %v2063_v26, %v2060_v8 }
 0x2d9   :  { %v2115_v41 = vpack.c.bf16 %v2064_v9, %v2061_v48  ;;  %v1645_v20 = vpop.f32.mrb[108].mxu1 }
 0x2da   :  { %v3541_v44 = vadd.f32 %v1645_v20, %v4443_v57  ;;  %v1647_v12 = vpop.f32.mrb[109].mxu1 }
 0x2db   :  { %v3542_v47 = vadd.f32 %v1647_v12, %v4447_v56  ;;  %v1649_v11 = vpop.f32.mrb[110].mxu1  ;;  %2463 = vmatprep.mubr.bf16.mxu0 %v2115_v41 }
 0x2dc   :  { %v3543_v14 = vadd.f32 %v1649_v11, %v4443_v57  ;;  %v1651_v39 = vpop.f32.mrb[111].mxu1  ;;  %2464 = vmatmul.mubr.bf16.gmra.mrb[200].mxu0 %v2114_v36  ;;  %v2066_v17 = vmax.f32 %v3541_v44, 0.0 }
 0x2dd   :  { %v3544_v24 = vadd.f32 %v1651_v39, %v4447_v56  ;;  %v2067_v32 = vmax.f32 %v3542_v47, 0.0 }
 0x2de   :  { %v2069_v38 = vmax.f32 %v3543_v14, 0.0 }
 0x2df   :  { %v2070_v23 = vmax.f32 %v3544_v24, 0.0 }
 0x2e0   :  { %v2117_v22 = vpack.c.bf16 %v2069_v38, %v2066_v17 }
 0x2e1   :  { %v2118_v13 = vpack.c.bf16 %v2070_v23, %v2067_v32 }
 0x2e3   :  { %2471 = vmatprep.mubr.bf16.mxu0 %v2118_v13 }
 0x2e4   :  { %2472 = vmatmul.mubr.bf16.gmra.mrb[204].mxu0 %v2117_v22 }
 0x33f   :  { %v3225_v15 = vpop.f32.mrb[144].mxu0  ;;  %v3447_v7 = vpop.f32.mrb[112].mxu1 }
 0x340   :  { %v3226_v31 = vpop.f32.mrb[145].mxu0  ;;  %v2514_v57 = vpop.f32.mrb[113].mxu1 }
 0x341   :  { %v3227_v34 = vadd.f32 %v3226_v31, %v3225_v15  ;;  %v3228_v6 = vpop.f32.mrb[146].mxu0  ;;  %v3448_v56 = vpop.f32.mrb[114].mxu1 }
 0x342   :  { %v3229_v58 = vpop.f32.mrb[147].mxu0  ;;  %v2517_v43 = vpop.f32.mrb[115].mxu1 }
 0x343   :  { %v2354_v35 = vadd.f32 %v3227_v34, %v4580_v29  ;;  %v3230_v55 = vadd.f32 %v3229_v58, %v3228_v6 }
 0x345   :  { %v2515_v52 = vadd.f32 %v2514_v57, %v2354_v35  ;;  %v2357_v54 = vadd.f32 %v3230_v55, %v4580_v29 }
 0x347   :  { %v3023_v37 = vmul.f32 -1.442695, %v2515_v52  ;;  %v2518_v42 = vadd.f32 %v2517_v43, %v2357_v54  ;;  %v3231_v25 = vpop.f32.mrb[148].mxu0  ;;  %v3451_v46 = vpop.f32.mrb[116].mxu1 }
 0x348   :  { %v3232_v61 = vpop.f32.mrb[149].mxu0  ;;  %v2530_v50 = vpop.f32.mrb[117].mxu1 }
 0x349   :  { %3760 = vpow2.f32 %v3023_v37  ;;  %v3024_v59 = vmul.f32 -1.442695, %v2518_v42  ;;  %v3233_v10 = vadd.f32 %v3232_v61, %v3231_v25  ;;  %v3234_v0 = vpop.f32.mrb[150].mxu0  ;;  %v3452_v27 = vpop.f32.mrb[118].mxu1 }
 0x34a   :  { %v3235_v45 = vpop.f32.mrb[151].mxu0  ;;  %v2533_v19 = vpop.f32.mrb[119].mxu1 }
 0x34b   :  { %3762 = vpow2.f32 %v3024_v59  ;;  %v2362_v33 = vadd.f32 %v3233_v10, %v4580_v29  ;;  %v3236_v53 = vadd.f32 %v3235_v45, %v3234_v0 }
 0x34d   :  { %v2523_v49 = vadd.f32 %v3447_v7, %v2362_v33  ;;  %v2365_v30 = vadd.f32 %v3236_v53, %v4580_v29 }
 0x34f   :  { %v3025_v1 = vmul.f32 -1.442695, %v2523_v49  ;;  %v2526_v63 = vadd.f32 %v3448_v56, %v2365_v30  ;;  %v3237_v28 = vpop.f32.mrb[152].mxu0  ;;  %v4586_v51 = vpop.f32.mrb[120].mxu1 }
 0x350   :  { %v3238_v2 = vpop.f32.mrb[153].mxu0  ;;  %v4588_v40 = vpop.f32.mrb[121].mxu1 }
 0x351   :  { %3764 = vpow2.f32 %v3025_v1  ;;  %v3026_v18 = vmul.f32 -1.442695, %v2526_v63  ;;  %v3239_v21 = vadd.f32 %v3238_v2, %v3237_v28  ;;  %v3240_v62 = vpop.f32.mrb[154].mxu0  ;;  %v4590_v3 = vpop.f32.mrb[122].mxu1 }
 0x352   :  { %v3241_v60 = vpop.f32.mrb[155].mxu0  ;;  %v4592_v16 = vpop.f32.mrb[123].mxu1 }
 0x353   :  { %v3761_v4 = vpop.eup %3760  ;;  %3766 = vpow2.f32 %v3026_v18  ;;  %v2370_v5 = vadd.f32 %v3239_v21, %v4580_v29  ;;  %v3242_v8 = vadd.f32 %v3241_v60, %v3240_v62 }
 0x354   :  { %v2737_v26 = vadd.f32 1.0, %v3761_v4 }
 0x355   :  { %v3763_v48 = vpop.eup %3762  ;;  %v2531_v9 = vadd.f32 %v2530_v50, %v2370_v5  ;;  %v2373_v36 = vadd.f32 %v3242_v8, %v4580_v29 }
 0x356   :  { %3768 = vrcp.f32 %v2737_v26  ;;  %v2738_v41 = vadd.f32 1.0, %v3763_v48 }
 0x357   :  { %v3027_v20 = vmul.f32 -1.442695, %v2531_v9  ;;  %v2534_v44 = vadd.f32 %v2533_v19, %v2373_v36  ;;  %v3243_v12 = vpop.f32.mrb[156].mxu0  ;;  %v4596_v47 = vpop.f32.mrb[124].mxu1 }
 0x358   :  { %3770 = vrcp.f32 %v2738_v41  ;;  %v3244_v11 = vpop.f32.mrb[157].mxu0  ;;  %v4598_v14 = vpop.f32.mrb[125].mxu1 }
 0x359   :  { %3772 = vpow2.f32 %v3027_v20  ;;  %v3028_v39 = vmul.f32 -1.442695, %v2534_v44  ;;  %v3245_v24 = vadd.f32 %v3244_v11, %v3243_v12  ;;  %v3246_v17 = vpop.f32.mrb[158].mxu0  ;;  %v4600_v38 = vpop.f32.mrb[126].mxu1 }
 0x35a   :  { %v3247_v32 = vpop.f32.mrb[159].mxu0  ;;  %v4602_v23 = vpop.f32.mrb[127].mxu1 }
 0x35b   :  { %v3765_v22 = vpop.eup %3764  ;;  %3774 = vpow2.f32 %v3028_v39  ;;  %v2378_v13 = vadd.f32 %v3245_v24, %v4580_v29  ;;  %v3248_v15 = vadd.f32 %v3247_v32, %v3246_v17 }
 0x35c   :  { %v2739_v7 = vadd.f32 1.0, %v3765_v22 }
 0x35d   :  { %v3767_v31 = vpop.eup %3766  ;;  %v2539_v57 = vadd.f32 %v3451_v46, %v2378_v13  ;;  %v2381_v34 = vadd.f32 %v3248_v15, %v4580_v29 }
 0x35e   :  { %3776 = vrcp.f32 %v2739_v7  ;;  %v2740_v6 = vadd.f32 1.0, %v3767_v31 }
 0x35f   :  { %v3029_v56 = vmul.f32 -1.442695, %v2539_v57  ;;  %v2542_v58 = vadd.f32 %v3452_v27, %v2381_v34  ;;  %v3249_v43 = vpop.f32.mrb[160].mxu0  ;;  %v4606_v35 = vpop.f32.mrb[128].mxu1 }
 0x360   :  { %v3769_v55 = vpop.eup %3768  ;;  %3778 = vrcp.f32 %v2740_v6  ;;  %v3250_v52 = vpop.f32.mrb[161].mxu0 }
 0x361   :  { %v4608_v54 = vpop.f32.mrb[129].mxu1  ;;  %2834 = vst.msk [vmem:[%s4821_s7] sm:$0xff] %vm2833_vm1, %v3769_v55  ;;  %3780 = vpow2.f32 %v3029_v56  ;;  %v3030_v37 = vmul.f32 -1.442695, %v2542_v58  ;;  %v3251_v42 = vadd.f32 %v3250_v52, %v3249_v43  ;;  %v3252_v25 = vpop.f32.mrb[162].mxu0 }
 0x362   :  { %v4614_v46 = vpop.f32.mrb[130].mxu1  ;;  %v3771_v61 = vpop.eup %3770 }
 0x363   :  { %v3253_v50 = vpop.f32.mrb[163].mxu0  ;;  %v4616_v59 = vpop.f32.mrb[131].mxu1  ;;  %2835 = vst.msk [vmem:[%s4821_s7 + $0x8] sm:$0xff] %vm2833_vm1, %v3771_v61  ;;  %3782 = vpow2.f32 %v3030_v37  ;;  %v2386_v0 = vadd.f32 %v3251_v42, %v4580_v29 }
 0x364   :  { %v3773_v10 = vpop.eup %3772  ;;  %v3254_v27 = vadd.f32 %v3253_v50, %v3252_v25 }
 0x365   :  { %v2741_v45 = vadd.f32 1.0, %v3773_v10  ;;  %v3775_v19 = vpop.eup %3774  ;;  %v2547_v33 = vadd.f32 %v4588_v40, %v2386_v0 }
 0x366   :  { %v2389_v53 = vadd.f32 %v3254_v27, %v4580_v29  ;;  %v2742_v49 = vadd.f32 1.0, %v3775_v19 }
 0x367   :  { %3784 = vrcp.f32 %v2741_v45  ;;  %v3031_v30 = vmul.f32 -1.442695, %v2547_v33  ;;  %v3255_v63 = vpop.f32.mrb[164].mxu0  ;;  %v4626_v28 = vpop.f32.mrb[132].mxu1 }
 0x368   :  { %v2550_v1 = vadd.f32 %v4592_v16, %v2389_v53  ;;  %v3777_v2 = vpop.eup %3776  ;;  %3786 = vrcp.f32 %v2742_v49  ;;  %v3256_v18 = vpop.f32.mrb[165].mxu0 }
 0x369   :  { %v4628_v21 = vpop.f32.mrb[133].mxu1  ;;  %2836 = vst.msk [vmem:[%s4821_s7 + $0x10] sm:$0xff] %vm2833_vm1, %v3777_v2  ;;  %3788 = vpow2.f32 %v3031_v30  ;;  %v3257_v62 = vadd.f32 %v3256_v18, %v3255_v63  ;;  %v3258_v60 = vpop.f32.mrb[166].mxu0 }
 0x36a   :  { %v3032_v40 = vmul.f32 -1.442695, %v2550_v1  ;;  %v4634_v4 = vpop.f32.mrb[134].mxu1  ;;  %v3779_v16 = vpop.eup %3778 }
 0x36b   :  { %v3259_v5 = vpop.f32.mrb[167].mxu0  ;;  %v4636_v8 = vpop.f32.mrb[135].mxu1  ;;  %2837 = vst.msk [vmem:[%s4821_s7 + $0x18] sm:$0xff] %vm2833_vm1, %v3779_v16  ;;  %v2394_v48 = vadd.f32 %v3257_v62, %v4580_v29 }
 0x36c   :  { %v3781_v26 = vpop.eup %3780  ;;  %3790 = vpow2.f32 %v3032_v40  ;;  %v3260_v9 = vadd.f32 %v3259_v5, %v3258_v60 }
 0x36d   :  { %v2743_v36 = vadd.f32 1.0, %v3781_v26  ;;  %v3783_v41 = vpop.eup %3782  ;;  %v2555_v20 = vadd.f32 %v4586_v51, %v2394_v48 }
 0x36e   :  { %v2397_v44 = vadd.f32 %v3260_v9, %v4580_v29  ;;  %v2744_v12 = vadd.f32 1.0, %v3783_v41 }
 0x36f   :  { %3792 = vrcp.f32 %v2743_v36  ;;  %v3033_v11 = vmul.f32 -1.442695, %v2555_v20  ;;  %v3261_v24 = vpop.f32.mrb[168].mxu0  ;;  %v4646_v17 = vpop.f32.mrb[136].mxu1 }
 0x370   :  { %v2558_v39 = vadd.f32 %v4590_v3, %v2397_v44  ;;  %3794 = vrcp.f32 %v2744_v12  ;;  %v3262_v22 = vpop.f32.mrb[169].mxu0  ;;  %v4648_v13 = vpop.f32.mrb[137].mxu1 }
 0x371   :  { %v3785_v32 = vpop.eup %3784  ;;  %3796 = vpow2.f32 %v3033_v11  ;;  %v3263_v15 = vadd.f32 %v3262_v22, %v3261_v24  ;;  %v3264_v7 = vpop.f32.mrb[170].mxu0 }
 0x372   :  { %2838 = vst.msk [vmem:[%s4821_s7 + $0x20] sm:$0xff] %vm2833_vm1, %v3785_v32  ;;  %v3034_v51 = vmul.f32 -1.442695, %v2558_v39  ;;  %v4654_v31 = vpop.f32.mrb[138].mxu1  ;;  %v3787_v3 = vpop.eup %3786 }
 0x373   :  { %v3265_v57 = vpop.f32.mrb[171].mxu0  ;;  %v4656_v34 = vpop.f32.mrb[139].mxu1  ;;  %2839 = vst.msk [vmem:[%s4821_s7 + $0x28] sm:$0xff] %vm2833_vm1, %v3787_v3  ;;  %v2402_v56 = vadd.f32 %v3263_v15, %v4580_v29 }
 0x374   :  { %v3789_v6 = vpop.eup %3788  ;;  %3798 = vpow2.f32 %v3034_v51  ;;  %v3266_v58 = vadd.f32 %v3265_v57, %v3264_v7 }
 0x375   :  { %v2745_v43 = vadd.f32 1.0, %v3789_v6  ;;  %v2563_v52 = vadd.f32 %v4598_v14, %v2402_v56 }
 0x376   :  { %v3791_v55 = vpop.eup %3790  ;;  %v2405_v37 = vadd.f32 %v3266_v58, %v4580_v29 }
 0x377   :  { %3800 = vrcp.f32 %v2745_v43  ;;  %v2746_v42 = vadd.f32 1.0, %v3791_v55  ;;  %v3035_v25 = vmul.f32 -1.442695, %v2563_v52  ;;  %v3267_v50 = vpop.f32.mrb[172].mxu0  ;;  %v4666_v10 = vpop.f32.mrb[140].mxu1 }
 0x378   :  { %v2566_v61 = vadd.f32 %v4602_v23, %v2405_v37  ;;  %v3268_v27 = vpop.f32.mrb[173].mxu0  ;;  %v4668_v45 = vpop.f32.mrb[141].mxu1 }
 0x379   :  { %v3793_v0 = vpop.eup %3792  ;;  %3802 = vrcp.f32 %v2746_v42  ;;  %v3269_v19 = vadd.f32 %v3268_v27, %v3267_v50  ;;  %v3270_v33 = vpop.f32.mrb[174].mxu0 }
 0x37a   :  { %2840 = vst.msk [vmem:[%s4821_s7 + $0x30] sm:$0xff] %vm2833_vm1, %v3793_v0  ;;  %3804 = vpow2.f32 %v3035_v25  ;;  %v3036_v14 = vmul.f32 -1.442695, %v2566_v61  ;;  %v4674_v53 = vpop.f32.mrb[142].mxu1  ;;  %v3795_v23 = vpop.eup %3794 }
 0x37b   :  { %v3271_v49 = vpop.f32.mrb[175].mxu0  ;;  %v4676_v30 = vpop.f32.mrb[143].mxu1  ;;  %2841 = vst.msk [vmem:[%s4821_s7 + $0x38] sm:$0xff] %vm2833_vm1, %v3795_v23  ;;  %v2410_v63 = vadd.f32 %v3269_v19, %v4580_v29 }
 0x37c   :  { %v3797_v1 = vpop.eup %3796  ;;  %3806 = vpow2.f32 %v3036_v14  ;;  %v3272_v2 = vadd.f32 %v3271_v49, %v3270_v33 }
 0x37d   :  { %v2747_v18 = vadd.f32 1.0, %v3797_v1  ;;  %v2571_v62 = vadd.f32 %v4596_v47, %v2410_v63 }
 0x37e   :  { %v3799_v40 = vpop.eup %3798  ;;  %v2413_v60 = vadd.f32 %v3272_v2, %v4580_v29 }
 0x37f   :  { %3808 = vrcp.f32 %v2747_v18  ;;  %v2748_v16 = vadd.f32 1.0, %v3799_v40  ;;  %v3037_v5 = vmul.f32 -1.442695, %v2571_v62  ;;  %v3273_v48 = vpop.f32.mrb[176].mxu0 }
 0x380   :  { %v2574_v26 = vadd.f32 %v4600_v38, %v2413_v60  ;;  %v3274_v36 = vpop.f32.mrb[177].mxu0 }
 0x381   :  { %v3801_v9 = vpop.eup %3800  ;;  %3810 = vrcp.f32 %v2748_v16  ;;  %v3275_v20 = vadd.f32 %v3274_v36, %v3273_v48  ;;  %v3276_v47 = vpop.f32.mrb[178].mxu0 }
 0x382   :  { %2842 = vst.msk [vmem:[%s4821_s7 + $0x40] sm:$0xff] %vm2833_vm1, %v3801_v9  ;;  %3812 = vpow2.f32 %v3037_v5  ;;  %v3038_v41 = vmul.f32 -1.442695, %v2574_v26  ;;  %v3277_v12 = vpop.f32.mrb[179].mxu0 }
 0x383   :  { %v3803_v44 = vpop.eup %3802  ;;  %v2418_v38 = vadd.f32 %v3275_v20, %v4580_v29  ;;  %v3278_v39 = vadd.f32 %v3277_v12, %v3276_v47 }
 0x384   :  { %v3805_v11 = vpop.eup %3804  ;;  %2843 = vst.msk [vmem:[%s4821_s7 + $0x48] sm:$0xff] %vm2833_vm1, %v3803_v44  ;;  %3814 = vpow2.f32 %v3038_v41 }
 0x385   :  { %v2749_v24 = vadd.f32 1.0, %v3805_v11  ;;  %v2579_v22 = vadd.f32 %v4608_v54, %v2418_v38  ;;  %v2421_v51 = vadd.f32 %v3278_v39, %v4580_v29 }
 0x386   :  { %v3807_v32 = vpop.eup %3806 }
 0x387   :  { %3816 = vrcp.f32 %v2749_v24  ;;  %v2750_v15 = vadd.f32 1.0, %v3807_v32  ;;  %v3039_v7 = vmul.f32 -1.442695, %v2579_v22  ;;  %v2582_v3 = vadd.f32 %v4616_v59, %v2421_v51  ;;  %v3279_v57 = vpop.f32.mrb[180].mxu0 }
 0x388   :  { %v3280_v56 = vpop.f32.mrb[181].mxu0 }
 0x389   :  { %v3809_v6 = vpop.eup %3808  ;;  %3818 = vrcp.f32 %v2750_v15  ;;  %v3040_v58 = vmul.f32 -1.442695, %v2582_v3  ;;  %v3281_v43 = vadd.f32 %v3280_v56, %v3279_v57  ;;  %v3282_v54 = vpop.f32.mrb[182].mxu0 }
 0x38a   :  { %2844 = vst.msk [vmem:[%s4821_s7 + $0x50] sm:$0xff] %vm2833_vm1, %v3809_v6  ;;  %3820 = vpow2.f32 %v3039_v7  ;;  %v3283_v52 = vpop.f32.mrb[183].mxu0 }
 0x38b   :  { %v3811_v55 = vpop.eup %3810  ;;  %3822 = vpow2.f32 %v3040_v58  ;;  %v2426_v59 = vadd.f32 %v3281_v43, %v4580_v29  ;;  %v3284_v42 = vadd.f32 %v3283_v52, %v3282_v54 }
 0x38c   :  { %v3813_v37 = vpop.eup %3812  ;;  %2845 = vst.msk [vmem:[%s4821_s7 + $0x58] sm:$0xff] %vm2833_vm1, %v3811_v55 }
 0x38d   :  { %v2751_v25 = vadd.f32 1.0, %v3813_v37  ;;  %v2587_v50 = vadd.f32 %v4606_v35, %v2426_v59  ;;  %v2429_v0 = vadd.f32 %v3284_v42, %v4580_v29 }
 0x38e   :  { %v3815_v61 = vpop.eup %3814 }
 0x38f   :  { %3824 = vrcp.f32 %v2751_v25  ;;  %v2752_v27 = vadd.f32 1.0, %v3815_v61  ;;  %v3041_v14 = vmul.f32 -1.442695, %v2587_v50  ;;  %v2590_v19 = vadd.f32 %v4614_v46, %v2429_v0  ;;  %v3285_v33 = vpop.f32.mrb[184].mxu0 }
 0x390   :  { %v3286_v49 = vpop.f32.mrb[185].mxu0 }
 0x391   :  { %v3817_v23 = vpop.eup %3816  ;;  %3826 = vrcp.f32 %v2752_v27  ;;  %v3042_v1 = vmul.f32 -1.442695, %v2590_v19  ;;  %v3287_v63 = vadd.f32 %v3286_v49, %v3285_v33  ;;  %v3288_v35 = vpop.f32.mrb[186].mxu0 }
 0x392   :  { %2846 = vst.msk [vmem:[%s4821_s7 + $0x60] sm:$0xff] %vm2833_vm1, %v3817_v23  ;;  %3828 = vpow2.f32 %v3041_v14  ;;  %v3289_v18 = vpop.f32.mrb[187].mxu0 }
 0x393   :  { %v3819_v2 = vpop.eup %3818  ;;  %3830 = vpow2.f32 %v3042_v1  ;;  %v2434_v46 = vadd.f32 %v3287_v63, %v4580_v29  ;;  %v3290_v62 = vadd.f32 %v3289_v18, %v3288_v35 }
 0x394   :  { %v3821_v40 = vpop.eup %3820  ;;  %2847 = vst.msk [vmem:[%s4821_s7 + $0x68] sm:$0xff] %vm2833_vm1, %v3819_v2 }
 0x395   :  { %v2753_v60 = vadd.f32 1.0, %v3821_v40  ;;  %v3823_v16 = vpop.eup %3822  ;;  %v2595_v5 = vadd.f32 %v4628_v21, %v2434_v46  ;;  %v2437_v26 = vadd.f32 %v3290_v62, %v4580_v29 }
 0x396   :  { %v2754_v48 = vadd.f32 1.0, %v3823_v16 }
 0x397   :  { %3832 = vrcp.f32 %v2753_v60  ;;  %v3043_v9 = vmul.f32 -1.442695, %v2595_v5  ;;  %v2598_v36 = vadd.f32 %v4636_v8, %v2437_v26  ;;  %v3291_v41 = vpop.f32.mrb[188].mxu0 }
 0x398   :  { %3834 = vrcp.f32 %v2754_v48  ;;  %v3292_v47 = vpop.f32.mrb[189].mxu0 }
 0x399   :  { %v3825_v20 = vpop.eup %3824  ;;  %3836 = vpow2.f32 %v3043_v9  ;;  %v3044_v44 = vmul.f32 -1.442695, %v2598_v36  ;;  %v3293_v12 = vadd.f32 %v3292_v47, %v3291_v41  ;;  %v3294_v21 = vpop.f32.mrb[190].mxu0 }
 0x39a   :  { %2848 = vst.msk [vmem:[%s4821_s7 + $0x70] sm:$0xff] %vm2833_vm1, %v3825_v20  ;;  %v3295_v38 = vpop.f32.mrb[191].mxu0 }
 0x39b   :  { %v3827_v11 = vpop.eup %3826  ;;  %3838 = vpow2.f32 %v3044_v44  ;;  %v2442_v8 = vadd.f32 %v3293_v12, %v4580_v29  ;;  %v3296_v24 = vadd.f32 %v3295_v38, %v3294_v21 }
 0x39c   :  { %v3829_v39 = vpop.eup %3828  ;;  %2849 = vst.msk [vmem:[%s4821_s7 + $0x78] sm:$0xff] %vm2833_vm1, %v3827_v11 }
 0x39d   :  { %v2755_v32 = vadd.f32 1.0, %v3829_v39  ;;  %v3831_v22 = vpop.eup %3830  ;;  %v2603_v51 = vadd.f32 %v4626_v28, %v2442_v8  ;;  %v2445_v15 = vadd.f32 %v3296_v24, %v4580_v29 }
 0x39e   :  { %v2756_v7 = vadd.f32 1.0, %v3831_v22 }
 0x39f   :  { %3840 = vrcp.f32 %v2755_v32  ;;  %v3045_v3 = vmul.f32 -1.442695, %v2603_v51  ;;  %v2606_v57 = vadd.f32 %v4634_v4, %v2445_v15  ;;  %v3297_v6 = vpop.f32.mrb[192].mxu0 }
 0x3a0   :  { %3842 = vrcp.f32 %v2756_v7  ;;  %v3298_v58 = vpop.f32.mrb[193].mxu0 }
 0x3a1   :  { %v3833_v56 = vpop.eup %3832  ;;  %3844 = vpow2.f32 %v3045_v3  ;;  %v3046_v43 = vmul.f32 -1.442695, %v2606_v57  ;;  %v3299_v54 = vadd.f32 %v3298_v58, %v3297_v6  ;;  %v3300_v28 = vpop.f32.mrb[194].mxu0 }
 0x3a2   :  { %2850 = vst.msk [vmem:[%s4821_s7 + $0x80] sm:$0xff] %vm2833_vm1, %v3833_v56  ;;  %v3835_v55 = vpop.eup %3834  ;;  %v3301_v52 = vpop.f32.mrb[195].mxu0 }
 0x3a3   :  { %v3837_v37 = vpop.eup %3836  ;;  %2851 = vst.msk [vmem:[%s4821_s7 + $0x88] sm:$0xff] %vm2833_vm1, %v3835_v55  ;;  %3846 = vpow2.f32 %v3046_v43  ;;  %v2450_v4 = vadd.f32 %v3299_v54, %v4580_v29  ;;  %v3302_v59 = vadd.f32 %v3301_v52, %v3300_v28 }
 0x3a4   :  { %v2757_v42 = vadd.f32 1.0, %v3837_v37 }
 0x3a5   :  { %v3839_v25 = vpop.eup %3838  ;;  %v2611_v61 = vadd.f32 %v4648_v13, %v2450_v4  ;;  %v2453_v50 = vadd.f32 %v3302_v59, %v4580_v29 }
 0x3a6   :  { %3848 = vrcp.f32 %v2757_v42  ;;  %v2758_v0 = vadd.f32 1.0, %v3839_v25 }
 0x3a7   :  { %v3047_v27 = vmul.f32 -1.442695, %v2611_v61  ;;  %v2614_v14 = vadd.f32 %v4656_v34, %v2453_v50  ;;  %v3303_v19 = vpop.f32.mrb[196].mxu0 }
 0x3a8   :  { %3850 = vrcp.f32 %v2758_v0  ;;  %v3304_v23 = vpop.f32.mrb[197].mxu0 }
 0x3a9   :  { %v3841_v33 = vpop.eup %3840  ;;  %3852 = vpow2.f32 %v3047_v27  ;;  %v3048_v49 = vmul.f32 -1.442695, %v2614_v14  ;;  %v3305_v1 = vadd.f32 %v3304_v23, %v3303_v19  ;;  %v3306_v13 = vpop.f32.mrb[198].mxu0 }
 0x3aa   :  { %2852 = vst.msk [vmem:[%s4821_s7 + $0x90] sm:$0xff] %vm2833_vm1, %v3841_v33  ;;  %v3843_v63 = vpop.eup %3842  ;;  %v3307_v35 = vpop.f32.mrb[199].mxu0 }
 0x3ab   :  { %v3845_v2 = vpop.eup %3844  ;;  %2853 = vst.msk [vmem:[%s4821_s7 + $0x98] sm:$0xff] %vm2833_vm1, %v3843_v63  ;;  %3854 = vpow2.f32 %v3048_v49  ;;  %v2458_v34 = vadd.f32 %v3305_v1, %v4580_v29  ;;  %v3308_v18 = vadd.f32 %v3307_v35, %v3306_v13 }
 0x3ac   :  { %v2759_v40 = vadd.f32 1.0, %v3845_v2 }
 0x3ad   :  { %v3847_v46 = vpop.eup %3846  ;;  %v2619_v62 = vadd.f32 %v4646_v17, %v2458_v34  ;;  %v2461_v60 = vadd.f32 %v3308_v18, %v4580_v29 }
 0x3ae   :  { %3856 = vrcp.f32 %v2759_v40  ;;  %v2760_v16 = vadd.f32 1.0, %v3847_v46 }
 0x3af   :  { %v3049_v5 = vmul.f32 -1.442695, %v2619_v62  ;;  %v2622_v26 = vadd.f32 %v4654_v31, %v2461_v60  ;;  %v3309_v48 = vpop.f32.mrb[200].mxu0 }
 0x3b0   :  { %v3849_v9 = vpop.eup %3848  ;;  %3858 = vrcp.f32 %v2760_v16  ;;  %v3310_v36 = vpop.f32.mrb[201].mxu0 }
 0x3b1   :  { %2854 = vst.msk [vmem:[%s4821_s7 + $0xa0] sm:$0xff] %vm2833_vm1, %v3849_v9  ;;  %3860 = vpow2.f32 %v3049_v5  ;;  %v3050_v41 = vmul.f32 -1.442695, %v2622_v26  ;;  %v3311_v20 = vadd.f32 %v3310_v36, %v3309_v48  ;;  %v3312_v17 = vpop.f32.mrb[202].mxu0 }
 0x3b2   :  { %v3851_v47 = vpop.eup %3850  ;;  %v3313_v44 = vpop.f32.mrb[203].mxu0 }
 0x3b3   :  { %v3853_v12 = vpop.eup %3852  ;;  %2855 = vst.msk [vmem:[%s4821_s7 + $0xa8] sm:$0xff] %vm2833_vm1, %v3851_v47  ;;  %3862 = vpow2.f32 %v3050_v41  ;;  %v2466_v31 = vadd.f32 %v3311_v20, %v4580_v29  ;;  %v3314_v21 = vadd.f32 %v3313_v44, %v3312_v17 }
 0x3b4   :  { %v2761_v11 = vadd.f32 1.0, %v3853_v12 }
 0x3b5   :  { %v3855_v38 = vpop.eup %3854  ;;  %v2627_v39 = vadd.f32 %v4668_v45, %v2466_v31  ;;  %v2469_v8 = vadd.f32 %v3314_v21, %v4580_v29 }
 0x3b6   :  { %3864 = vrcp.f32 %v2761_v11  ;;  %v2762_v24 = vadd.f32 1.0, %v3855_v38 }
 0x3b7   :  { %v3051_v32 = vmul.f32 -1.442695, %v2627_v39  ;;  %v2630_v22 = vadd.f32 %v4676_v30, %v2469_v8  ;;  %v3315_v51 = vpop.f32.mrb[204].mxu0 }
 0x3b8   :  { %v3857_v15 = vpop.eup %3856  ;;  %3866 = vrcp.f32 %v2762_v24  ;;  %v3316_v7 = vpop.f32.mrb[205].mxu0 }
 0x3b9   :  { %2856 = vst.msk [vmem:[%s4821_s7 + $0xb0] sm:$0xff] %vm2833_vm1, %v3857_v15  ;;  %3868 = vpow2.f32 %v3051_v32  ;;  %v3052_v3 = vmul.f32 -1.442695, %v2630_v22  ;;  %v3317_v57 = vadd.f32 %v3316_v7, %v3315_v51  ;;  %v3318_v45 = vpop.f32.mrb[206].mxu0 }
 0x3ba   :  { %v3859_v6 = vpop.eup %3858  ;;  %v3319_v56 = vpop.f32.mrb[207].mxu0 }
 0x3bb   :  { %v3861_v58 = vpop.eup %3860  ;;  %2857 = vst.msk [vmem:[%s4821_s7 + $0xb8] sm:$0xff] %vm2833_vm1, %v3859_v6  ;;  %3870 = vpow2.f32 %v3052_v3  ;;  %v2474_v30 = vadd.f32 %v3317_v57, %v4580_v29  ;;  %v3320_v43 = vadd.f32 %v3319_v56, %v3318_v45 }
 0x3bc   :  { %v2763_v54 = vadd.f32 1.0, %v3861_v58 }
 0x3bd   :  { %v3863_v28 = vpop.eup %3862  ;;  %v2635_v55 = vadd.f32 %v4666_v10, %v2474_v30  ;;  %v2477_v52 = vadd.f32 %v3320_v43, %v4580_v29 }
 0x3be   :  { %3872 = vrcp.f32 %v2763_v54  ;;  %v2764_v37 = vadd.f32 1.0, %v3863_v28 }
 0x3bf   :  { %v3053_v4 = vmul.f32 -1.442695, %v2635_v55  ;;  %v2638_v59 = vadd.f32 %v4674_v53, %v2477_v52 }
 0x3c0   :  { %v3865_v42 = vpop.eup %3864  ;;  %3874 = vrcp.f32 %v2764_v37 }
 0x3c1   :  { %2858 = vst.msk [vmem:[%s4821_s7 + $0xc0] sm:$0xff] %vm2833_vm1, %v3865_v42  ;;  %3876 = vpow2.f32 %v3053_v4  ;;  %v3054_v25 = vmul.f32 -1.442695, %v2638_v59 }
 0x3c2   :  { %v3867_v61 = vpop.eup %3866 }
 0x3c3   :  { %v3869_v50 = vpop.eup %3868  ;;  %2859 = vst.msk [vmem:[%s4821_s7 + $0xc8] sm:$0xff] %vm2833_vm1, %v3867_v61  ;;  %3878 = vpow2.f32 %v3054_v25 }
 0x3c4   :  { %v2765_v29 = vadd.f32 1.0, %v3869_v50 }
 0x3c5   :  { %v3871_v10 = vpop.eup %3870 }
 0x3c6   :  { %3880 = vrcp.f32 %v2765_v29  ;;  %v2766_v53 = vadd.f32 1.0, %v3871_v10 }
 0x3c8   :  { %v3873_v0 = vpop.eup %3872  ;;  %3882 = vrcp.f32 %v2766_v53 }
 0x3c9   :  { %2860 = vst.msk [vmem:[%s4821_s7 + $0xd0] sm:$0xff] %vm2833_vm1, %v3873_v0 }
 0x3ca   :  { %v3875_v27 = vpop.eup %3874 }
 0x3cb   :  { %v3877_v14 = vpop.eup %3876  ;;  %2861 = vst.msk [vmem:[%s4821_s7 + $0xd8] sm:$0xff] %vm2833_vm1, %v3875_v27 }
 0x3cc   :  { %v2767_v19 = vadd.f32 1.0, %v3877_v14 }
 0x3cd   :  { %v3879_v33 = vpop.eup %3878 }
 0x3ce   :  { %3884 = vrcp.f32 %v2767_v19  ;;  %v2768_v23 = vadd.f32 1.0, %v3879_v33 }
 0x3d0   :  { %v3881_v49 = vpop.eup %3880  ;;  %3886 = vrcp.f32 %v2768_v23 }
 0x3d1   :  { %2862 = vst.msk [vmem:[%s4821_s7 + $0xe0] sm:$0xff] %vm2833_vm1, %v3881_v49 }
 0x3d2   :  { %v3883_v1 = vpop.eup %3882 }
 0x3d3   :  { %2863 = vst.msk [vmem:[%s4821_s7 + $0xe8] sm:$0xff] %vm2833_vm1, %v3883_v1 }
 0x3d8   :  { %v3885_v13 = vpop.eup %3884 }
 0x3d9   :  { %2864 = vst.msk [vmem:[%s4821_s7 + $0xf0] sm:$0xff] %vm2833_vm1, %v3885_v13 }
 0x3da   :  { %v3887_v63 = vpop.eup %3886 }
 0x3db   :  { %2865 = vst.msk [vmem:[%s4821_s7 + $0xf8] sm:$0xff] %vm2833_vm1, %v3887_v63 }
 0x3dc   :  { %2870 = vsyncpa [#allocation3], 1 }
 0x3dd   :  { %2871 = vsyncpa [#allocation5], 1 }

</bundles_post_ra>
